<compile_context>
chip_gen: v7x
topology: tpu7x:2x2x1
jax: 0.10.0
libtpu: 0.0.40
codegen_flags: <defaults>
</compile_context>

<pallas_src>
import functools

import jax
import jax.numpy as jnp
from jax.experimental import pallas as pl
from jax.experimental.pallas import tpu as pltpu

HIDDEN = 64                 # per-network hidden width (matches the PyTorch module)
FUSED_HIDDEN = 2 * HIDDEN   # actor + critic stacked -> 128-wide contraction
OUT_COLS = 8                # packed output columns: action, log_prob, entropy, value, pad


def _round_up(x, m):
    return ((x + m - 1) // m) * m


def ppo_kernel(x_ref,                           # [TB, obs_dim]
               aux_ref,                         # sample: [TB, OUT3] f32 gumbel | given: [TB, 1] int32 action
               w1_ref, b1_ref,                  # [obs, 128], [1, 128]
               w2_ref, b2_ref,                  # [128, 128], [1, 128]
               w3_ref, b3_ref,                  # [128, OUT3], [1, OUT3]
               out_ref,                         # [TB, 8] f32 packed outputs
               *, num_actions, sample):
    f32 = jnp.float32
    x = x_ref[...].astype(w1_ref.dtype)

    # ---- fused actor+critic MLP: 3 matmuls (block-diagonal W2/W3) ----
    h = jnp.dot(x, w1_ref[...], preferred_element_type=f32) + b1_ref[...]
    h = jnp.maximum(h, 0.0).astype(w2_ref.dtype)
    h = jnp.dot(h, w2_ref[...], preferred_element_type=f32) + b2_ref[...]
    h = jnp.maximum(h, 0.0).astype(w3_ref.dtype)
    out3 = jnp.dot(h, w3_ref[...], preferred_element_type=f32) + b3_ref[...]
    # out3[:, :A] = actor logits, out3[:, A] = critic value, rest = padding

    tb, width = out3.shape
    col = jax.lax.broadcasted_iota(jnp.int32, (tb, width), 1)
    is_logit = col < num_actions
    logits = jnp.where(is_logit, out3, f32(-1e30))        # keep padding mask in f32
    # value extraction via masked sum (robust lowering; avoids an unaligned lane slice)
    value = jnp.sum(jnp.where(col == num_actions, out3, 0.0), axis=-1, keepdims=True)

    # ---- Categorical(logits): single exp pass, no materialized logp ----
    m = jnp.max(logits, axis=-1, keepdims=True)
    shifted = logits - m
    exp_shifted = jnp.exp(shifted)
    sum_exp = jnp.sum(exp_shifted, axis=-1, keepdims=True)
    lse = jnp.log(sum_exp)
    probs = exp_shifted * (1.0 / sum_exp)                  # padded cols -> exactly 0

    if sample:
        # Gumbel-max sampling == Categorical(logits).sample(); noise from wrapper.
        z = logits + aux_ref[...]                          # padded cols stay ~ -1e30
        zmax = jnp.max(z, axis=-1, keepdims=True)
        action = jnp.min(jnp.where(z >= zmax, col, jnp.int32(width)),
                         axis=-1, keepdims=True)           # [TB, 1] int32
    else:
        # TODO(synk): provided actions in [num_actions, 128) hit a padded column
        # and yield log_prob ~ -1e30 (torch would index-error); no runtime check.
        action = aux_ref[...]                              # [TB, 1] int32

    # ---- log_prob(action) and entropy (reuse shifted / lse / probs) ----
    onehot = col == action
    log_prob = jnp.sum(jnp.where(onehot, shifted, 0.0), axis=-1, keepdims=True) - lse
    entropy = lse - jnp.sum(probs * shifted, axis=-1, keepdims=True)

    # ---- pack all outputs into one [TB, 8] slab (single output stream) ----
    col8 = jax.lax.broadcasted_iota(jnp.int32, (tb, out_ref.shape[1]), 1)
    packed = jnp.where(col8 == 0, action.astype(f32),
             jnp.where(col8 == 1, log_prob,
             jnp.where(col8 == 2, entropy,
             jnp.where(col8 == 3, value, f32(0.0)))))
    out_ref[...] = packed


def init_params(key, obs_dim, n_actions):
    """Deterministic synthetic init matching the PyTorch module's shapes.
    Weights stored as [in, out] (transpose of torch's Linear convention)."""
    ks = jax.random.split(key, 6)

    def w(k, shape, scale):
        return (scale * jax.random.normal(k, shape)).astype(jnp.float32)

    return {
        # actor
        "aw1": w(ks[0], (obs_dim, HIDDEN), 0.5),
        "ab1": jnp.zeros((1, HIDDEN), jnp.float32),
        "aw2": w(ks[1], (HIDDEN, HIDDEN), 0.2),
        "ab2": jnp.zeros((1, HIDDEN), jnp.float32),
        "aw3": w(ks[2], (HIDDEN, n_actions), 0.01),
        "ab3": jnp.zeros((1, n_actions), jnp.float32),
        # critic
        "cw1": w(ks[3], (obs_dim, HIDDEN), 0.5),
        "cb1": jnp.zeros((1, HIDDEN), jnp.float32),
        "cw2": w(ks[4], (HIDDEN, HIDDEN), 0.2),
        "cb2": jnp.zeros((1, HIDDEN), jnp.float32),
        "cw3": w(ks[5], (HIDDEN, 1), 1.0),
        "cb3": jnp.zeros((1, 1), jnp.float32),
    }


def fuse_params(p, compute_dtype=jnp.float32):
    """Fuse actor+critic into stacked / block-diagonal weights (done once, outside the kernel).

    compute_dtype=jnp.bfloat16 is recommended on v6e/v7x: halves weight VMEM and
    uses the native bf16 MXU path.  Biases and all distribution math stay f32.
    """
    A = int(p["aw3"].shape[1])
    H = HIDDEN
    OUT3 = _round_up(A + 1, 128)          # A logits + 1 value column, lane-padded to 128

    w1 = jnp.concatenate([p["aw1"], p["cw1"]], axis=1)                # [obs, 128]
    b1 = jnp.concatenate([p["ab1"], p["cb1"]], axis=1)                # [1, 128]

    w2 = jnp.zeros((FUSED_HIDDEN, FUSED_HIDDEN), jnp.float32)
    w2 = w2.at[:H, :H].set(p["aw2"]).at[H:, H:].set(p["cw2"])         # block-diag [128, 128]
    b2 = jnp.concatenate([p["ab2"], p["cb2"]], axis=1)                # [1, 128]

    w3 = jnp.zeros((FUSED_HIDDEN, OUT3), jnp.float32)
    w3 = w3.at[:H, :A].set(p["aw3"]).at[H:, A:A + 1].set(p["cw3"])    # block-diag [128, OUT3]
    b3 = jnp.zeros((1, OUT3), jnp.float32)
    b3 = b3.at[:, :A].set(p["ab3"]).at[:, A:A + 1].set(p["cb3"])

    return {
        "w1": w1.astype(compute_dtype), "b1": b1,
        "w2": w2.astype(compute_dtype), "b2": b2,
        "w3": w3.astype(compute_dtype), "b3": b3,
        "num_actions": A,
    }


def ppo_forward(fused, x, action=None, key=None, *, tb=2048, vmem_limit_bytes=None):
    """Equivalent of PPOAgent.forward(x, action) -> (action, log_prob, entropy, value).

    tb: batch tile (multiple of 128).  v7x: 2048-4096 (64 MiB VMEM, prefer bf16
    weights + explicit vmem_limit_bytes); v6e: up to 4096-8192; v5e: raise
    vmem_limit_bytes past the 16 MiB default scoped limit for tb >= 2048.
    """
    B, obs_dim = x.shape
    A = fused["num_actions"]
    OUT3 = fused["w3"].shape[1]

    B128 = _round_up(B, 128)
    TB = min(_round_up(tb, 128), B128)
    # Guarantee >= 2 grid steps when the batch allows it, so the "parallel" grid
    # axis actually shards across v7x's two TensorCores.
    if B128 >= 256 and pl.cdiv(B128, TB) < 2:
        TB = _round_up((B128 + 1) // 2, 128)
    grid = (pl.cdiv(B, TB),)

    sample = action is None
    if sample:
        assert key is not None, "need a PRNG key to sample the action"
        aux = jax.random.gumbel(key, (B, OUT3), jnp.float32)          # lane-dense noise tile
        aux_spec = pl.BlockSpec((TB, OUT3), lambda i: (i, 0))
    else:
        aux = jnp.asarray(action).reshape(B, 1).astype(jnp.int32)     # [B, 1] provided actions
        aux_spec = pl.BlockSpec((TB, 1), lambda i: (i, 0))

    def w_spec(arr):
        return pl.BlockSpec(arr.shape, lambda i: (0, 0))   # weights stay VMEM-resident

    cp_kwargs = dict(dimension_semantics=("parallel",))    # v7x: shard batch across 2 TCs
    if vmem_limit_bytes is not None:
        cp_kwargs["vmem_limit_bytes"] = vmem_limit_bytes

    out = pl.pallas_call(
        functools.partial(ppo_kernel, num_actions=A, sample=sample),
        out_shape=jax.ShapeDtypeStruct((B, OUT_COLS), jnp.float32),
        grid_spec=pltpu.PrefetchScalarGridSpec(
            num_scalar_prefetch=0,
            grid=grid,
            in_specs=[
                pl.BlockSpec((TB, obs_dim), lambda i: (i, 0)),        # x (no wrapper-side pad)
                aux_spec,                                             # gumbel | provided action
                w_spec(fused["w1"]), w_spec(fused["b1"]),
                w_spec(fused["w2"]), w_spec(fused["b2"]),
                w_spec(fused["w3"]), w_spec(fused["b3"]),
            ],
            out_specs=pl.BlockSpec((TB, OUT_COLS), lambda i: (i, 0)),
        ),
        compiler_params=pltpu.CompilerParams(**cp_kwargs),
    )(x, aux,
      fused["w1"], fused["b1"], fused["w2"], fused["b2"], fused["w3"], fused["b3"])

    action_o = out[:, 0].astype(jnp.int32)   # torch returns int64; int32 here
    log_prob = out[:, 1]
    entropy = out[:, 2]
    value = out[:, 3:4]
    return action_o, log_prob, entropy, value


def _ref_forward(params, x, action):
    """Pure-JAX reference for the action-given quantities (no Pallas)."""
    def mlp(z, w1, b1, w2, b2, w3, b3):
        h = jnp.maximum(z @ w1 + b1, 0.0)
        h = jnp.maximum(h @ w2 + b2, 0.0)
        return h @ w3 + b3

    logits = mlp(x, params["aw1"], params["ab1"], params["aw2"], params["ab2"],
                 params["aw3"], params["ab3"])
    value = mlp(x, params["cw1"], params["cb1"], params["cw2"], params["cb2"],
                params["cw3"], params["cb3"])
    logp = jax.nn.log_softmax(logits, axis=-1)
    lp_a = jnp.take_along_axis(logp, action[:, None].astype(jnp.int32), axis=-1)[:, 0]
    ent = -jnp.sum(jnp.exp(logp) * logp, axis=-1)
    return lp_a, ent, value


if __name__ == "__main__":
    key = jax.random.PRNGKey(0)
    k_param, k_obs, k_sample, k_big, k_big_s = jax.random.split(key, 5)

    B, OBS_DIM, N_ACTIONS = 8, 8, 6
    params = init_params(k_param, OBS_DIM, N_ACTIONS)
    fused = fuse_params(params)                       # f32; pass jnp.bfloat16 for v6e/v7x MXU
    x = jax.random.normal(k_obs, (B, OBS_DIM), dtype=jnp.float32)

    # Path 1: action=None -> Gumbel-max sampling (noise drawn in the wrapper)
    action, log_prob, entropy, value = ppo_forward(fused, x, action=None, key=k_sample)
    jax.block_until_ready((action, log_prob, entropy, value))
    assert action.shape == (B,) and log_prob.shape == (B,)
    assert entropy.shape == (B,) and value.shape == (B, 1)
    assert bool(jnp.all((action >= 0) & (action < N_ACTIONS)))

    # Path 2: action provided -> log_prob/entropy of the given actions (training path)
    given = jnp.arange(B, dtype=jnp.int32) % N_ACTIONS
    action2, log_prob2, entropy2, value2 = ppo_forward(fused, x, action=given)
    jax.block_until_ready((action2, log_prob2, entropy2, value2))
    assert bool(jnp.all(action2 == given))

    # Numerical check against a pure-JAX reference (generous tol: default matmul precision)
    lp_ref, ent_ref, val_ref = _ref_forward(params, x, given)
    assert bool(jnp.allclose(log_prob2, lp_ref, rtol=5e-2, atol=5e-2))
    assert bool(jnp.allclose(entropy2, ent_ref, rtol=5e-2, atol=5e-2))
    assert bool(jnp.allclose(value2, val_ref, rtol=5e-2, atol=5e-2))
    lp_s_ref, ent_s_ref, _ = _ref_forward(params, x, action)
    assert bool(jnp.allclose(log_prob, lp_s_ref, rtol=5e-2, atol=5e-2))
    assert bool(jnp.allclose(entropy, ent_s_ref, rtol=5e-2, atol=5e-2))

    # Path 3: multi-tile grid with a partial last block (no wrapper-side padding)
    Bb = 272
    xb = jax.random.normal(k_big, (Bb, OBS_DIM), dtype=jnp.float32)
    ab, lpb, enb, vb = ppo_forward(fused, xb, action=None, key=k_big_s, tb=128)
    jax.block_until_ready((ab, lpb, enb, vb))
    assert ab.shape == (Bb,) and vb.shape == (Bb, 1)
    assert bool(jnp.all((ab >= 0) & (ab < N_ACTIONS)))
    assert bool(jnp.all(jnp.isfinite(lpb))) and bool(jnp.all(jnp.isfinite(vb)))

    # Path 4: bf16 compute path (v6e/v7x MXU) — smoke test, distribution math stays f32
    fused_bf16 = fuse_params(params, compute_dtype=jnp.bfloat16)
    a4, lp4, en4, v4 = ppo_forward(fused_bf16, x, action=given)
    jax.block_until_ready((a4, lp4, en4, v4))
    assert bool(jnp.all(a4 == given))
    assert bool(jnp.all(jnp.isfinite(lp4))) and bool(jnp.all(jnp.isfinite(v4)))

    print("KERNEL_OK")
</pallas_src>

<mosaic_0001>
module attributes {stable_mosaic.version = 11 : i64} {
  func.func @ppo_kernel(%arg0: i32, %arg1: memref<128x8xf32, #tpu.memory_space<vmem>>, %arg2: memref<128x128xf32, #tpu.memory_space<vmem>>, %arg3: memref<8x128xf32, #tpu.memory_space<vmem>>, %arg4: memref<1x128xf32, #tpu.memory_space<vmem>>, %arg5: memref<128x128xf32, #tpu.memory_space<vmem>>, %arg6: memref<1x128xf32, #tpu.memory_space<vmem>>, %arg7: memref<128x128xf32, #tpu.memory_space<vmem>>, %arg8: memref<1x128xf32, #tpu.memory_space<vmem>>, %arg9: memref<128x8xf32, #tpu.memory_space<vmem>>) attributes {dimension_semantics = [#tpu.dimension_semantics<parallel>], iteration_bounds = array<i64: 1>, scalar_prefetch = 0 : i64, scratch_operands = 0 : i64, tpu.core_type = #tpu.core_type<tc>, window_params = [{transform_indices = @transform_0, window_bounds = array<i64: 128, 8>}, {transform_indices = @transform_1, window_bounds = array<i64: 128, 128>}, {pipeline_mode = #tpu.pipeline_mode<synchronous>, transform_indices = @transform_2, window_bounds = array<i64: 8, 128>}, {pipeline_mode = #tpu.pipeline_mode<synchronous>, transform_indices = @transform_3, window_bounds = array<i64: 1, 128>}, {pipeline_mode = #tpu.pipeline_mode<synchronous>, transform_indices = @transform_4, window_bounds = array<i64: 128, 128>}, {pipeline_mode = #tpu.pipeline_mode<synchronous>, transform_indices = @transform_5, window_bounds = array<i64: 1, 128>}, {pipeline_mode = #tpu.pipeline_mode<synchronous>, transform_indices = @transform_6, window_bounds = array<i64: 128, 128>}, {pipeline_mode = #tpu.pipeline_mode<synchronous>, transform_indices = @transform_7, window_bounds = array<i64: 1, 128>}, {transform_indices = @transform_8, window_bounds = array<i64: 128, 8>}]} {
    %c0 = arith.constant 0 : index
    %c0_0 = arith.constant 0 : index
    %0 = vector.load %arg1[%c0, %c0_0] : memref<128x8xf32, #tpu.memory_space<vmem>>, vector<128x8xf32>
    %c0_1 = arith.constant 0 : index
    %c0_2 = arith.constant 0 : index
    %1 = vector.load %arg3[%c0_1, %c0_2] : memref<8x128xf32, #tpu.memory_space<vmem>>, vector<8x128xf32>
    %cst = arith.constant dense<0.000000e+00> : vector<128x128xf32>
    %2 = tpu.matmul %0, %1, %cst {dimension_numbers = #tpu.dot_dimension_numbers<[1], [0], [0], [1], [0, 0, 1, 1], [], []>} : vector<128x8xf32>, vector<8x128xf32>, vector<128x128xf32> -> vector<128x128xf32>
    %c0_3 = arith.constant 0 : index
    %c0_4 = arith.constant 0 : index
    %3 = vector.load %arg4[%c0_3, %c0_4] : memref<1x128xf32, #tpu.memory_space<vmem>>, vector<1x128xf32>
    %4 = vector.broadcast %3 : vector<1x128xf32> to vector<128x128xf32>
    %5 = arith.addf %2, %4 : vector<128x128xf32>
    %cst_5 = arith.constant 0.000000e+00 : f32
    %6 = vector.broadcast %cst_5 : f32 to vector<128x128xf32>
    %7 = arith.maximumf %5, %6 : vector<128x128xf32>
    %c0_6 = arith.constant 0 : index
    %c0_7 = arith.constant 0 : index
    %8 = vector.load %arg5[%c0_6, %c0_7] : memref<128x128xf32, #tpu.memory_space<vmem>>, vector<128x128xf32>
    %cst_8 = arith.constant dense<0.000000e+00> : vector<128x128xf32>
    %9 = tpu.matmul %7, %8, %cst_8 {dimension_numbers = #tpu.dot_dimension_numbers<[1], [0], [0], [1], [0, 0, 1, 1], [], []>} : vector<128x128xf32>, vector<128x128xf32>, vector<128x128xf32> -> vector<128x128xf32>
    %c0_9 = arith.constant 0 : index
    %c0_10 = arith.constant 0 : index
    %10 = vector.load %arg6[%c0_9, %c0_10] : memref<1x128xf32, #tpu.memory_space<vmem>>, vector<1x128xf32>
    %11 = vector.broadcast %10 : vector<1x128xf32> to vector<128x128xf32>
    %12 = arith.addf %9, %11 : vector<128x128xf32>
    %cst_11 = arith.constant 0.000000e+00 : f32
    %13 = vector.broadcast %cst_11 : f32 to vector<128x128xf32>
    %14 = arith.maximumf %12, %13 : vector<128x128xf32>
    %c0_12 = arith.constant 0 : index
    %c0_13 = arith.constant 0 : index
    %15 = vector.load %arg7[%c0_12, %c0_13] : memref<128x128xf32, #tpu.memory_space<vmem>>, vector<128x128xf32>
    %cst_14 = arith.constant dense<0.000000e+00> : vector<128x128xf32>
    %16 = tpu.matmul %14, %15, %cst_14 {dimension_numbers = #tpu.dot_dimension_numbers<[1], [0], [0], [1], [0, 0, 1, 1], [], []>} : vector<128x128xf32>, vector<128x128xf32>, vector<128x128xf32> -> vector<128x128xf32>
    %c0_15 = arith.constant 0 : index
    %c0_16 = arith.constant 0 : index
    %17 = vector.load %arg8[%c0_15, %c0_16] : memref<1x128xf32, #tpu.memory_space<vmem>>, vector<1x128xf32>
    %18 = vector.broadcast %17 : vector<1x128xf32> to vector<128x128xf32>
    %19 = arith.addf %16, %18 : vector<128x128xf32>
    %20 = tpu.iota {dimensions = array<i32: 1>} : vector<128x128xi32>
    %c6_i32 = arith.constant 6 : i32
    %21 = vector.broadcast %c6_i32 : i32 to vector<128x128xi32>
    %22 = arith.cmpi slt, %20, %21 : vector<128x128xi32>
    %cst_17 = arith.constant -1.000000e+30 : f32
    %23 = vector.broadcast %cst_17 : f32 to vector<128x128xf32>
    %24 = arith.select %22, %19, %23 : vector<128x128xi1>, vector<128x128xf32>
    %c6_i32_18 = arith.constant 6 : i32
    %25 = vector.broadcast %c6_i32_18 : i32 to vector<128x128xi32>
    %26 = arith.cmpi eq, %20, %25 : vector<128x128xi32>
    %cst_19 = arith.constant 0.000000e+00 : f32
    %27 = vector.broadcast %cst_19 : f32 to vector<128x128xf32>
    %28 = arith.select %26, %19, %27 : vector<128x128xi1>, vector<128x128xf32>
    %cst_20 = arith.constant dense<0.000000e+00> : vector<128xf32>
    %29 = vector.multi_reduction <add>, %28, %cst_20 [1] : vector<128x128xf32> to vector<128xf32>
    %30 = vector.shape_cast %29 : vector<128xf32> to vector<128x1xf32>
    %cst_21 = arith.constant dense<0xFF800000> : vector<128xf32>
    %31 = vector.multi_reduction <maximumf>, %24, %cst_21 [1] : vector<128x128xf32> to vector<128xf32>
    %32 = vector.shape_cast %31 : vector<128xf32> to vector<128x1xf32>
    %33 = vector.broadcast %32 : vector<128x1xf32> to vector<128x128xf32>
    %34 = arith.subf %24, %33 : vector<128x128xf32>
    %35 = math.exp %34 : vector<128x128xf32>
    %cst_22 = arith.constant dense<0.000000e+00> : vector<128xf32>
    %36 = vector.multi_reduction <add>, %35, %cst_22 [1] : vector<128x128xf32> to vector<128xf32>
    %37 = vector.shape_cast %36 : vector<128xf32> to vector<128x1xf32>
    %38 = math.log %37 : vector<128x1xf32>
    %cst_23 = arith.constant 1.000000e+00 : f32
    %39 = vector.broadcast %cst_23 : f32 to vector<128x1xf32>
    %40 = arith.divf %39, %37 : vector<128x1xf32>
    %41 = vector.broadcast %40 : vector<128x1xf32> to vector<128x128xf32>
    %42 = arith.mulf %35, %41 : vector<128x128xf32>
    %c0_24 = arith.constant 0 : index
    %c0_25 = arith.constant 0 : index
    %43 = vector.load %arg2[%c0_24, %c0_25] : memref<128x128xf32, #tpu.memory_space<vmem>>, vector<128x128xf32>
    %44 = arith.addf %24, %43 : vector<128x128xf32>
    %cst_26 = arith.constant dense<0xFF800000> : vector<128xf32>
    %45 = vector.multi_reduction <maximumf>, %44, %cst_26 [1] : vector<128x128xf32> to vector<128xf32>
    %46 = vector.shape_cast %45 : vector<128xf32> to vector<128x1xf32>
    %47 = vector.broadcast %46 : vector<128x1xf32> to vector<128x128xf32>
    %48 = arith.cmpf oge, %44, %47 : vector<128x128xf32>
    %c128_i32 = arith.constant 128 : i32
    %49 = vector.broadcast %c128_i32 : i32 to vector<128x128xi32>
    %50 = arith.select %48, %20, %49 : vector<128x128xi1>, vector<128x128xi32>
    %cst_27 = arith.constant dense<2147483647> : vector<128xi32>
    %51 = vector.multi_reduction <minsi>, %50, %cst_27 [1] : vector<128x128xi32> to vector<128xi32>
    %52 = vector.shape_cast %51 : vector<128xi32> to vector<128x1xi32>
    %53 = vector.broadcast %52 : vector<128x1xi32> to vector<128x128xi32>
    %54 = arith.cmpi eq, %20, %53 : vector<128x128xi32>
    %cst_28 = arith.constant 0.000000e+00 : f32
    %55 = vector.broadcast %cst_28 : f32 to vector<128x128xf32>
    %56 = arith.select %54, %34, %55 : vector<128x128xi1>, vector<128x128xf32>
    %cst_29 = arith.constant dense<0.000000e+00> : vector<128xf32>
    %57 = vector.multi_reduction <add>, %56, %cst_29 [1] : vector<128x128xf32> to vector<128xf32>
    %58 = vector.shape_cast %57 : vector<128xf32> to vector<128x1xf32>
    %59 = arith.subf %58, %38 : vector<128x1xf32>
    %60 = arith.mulf %42, %34 : vector<128x128xf32>
    %cst_30 = arith.constant dense<0.000000e+00> : vector<128xf32>
    %61 = vector.multi_reduction <add>, %60, %cst_30 [1] : vector<128x128xf32> to vector<128xf32>
    %62 = vector.shape_cast %61 : vector<128xf32> to vector<128x1xf32>
    %63 = arith.subf %38, %62 : vector<128x1xf32>
    %64 = tpu.iota {dimensions = array<i32: 1>} : vector<128x8xi32>
    %c0_i32 = arith.constant 0 : i32
    %65 = vector.broadcast %c0_i32 : i32 to vector<128x8xi32>
    %66 = arith.cmpi eq, %64, %65 : vector<128x8xi32>
    %67 = arith.sitofp %52 : vector<128x1xi32> to vector<128x1xf32>
    %c1_i32 = arith.constant 1 : i32
    %68 = vector.broadcast %c1_i32 : i32 to vector<128x8xi32>
    %69 = arith.cmpi eq, %64, %68 : vector<128x8xi32>
    %c2_i32 = arith.constant 2 : i32
    %70 = vector.broadcast %c2_i32 : i32 to vector<128x8xi32>
    %71 = arith.cmpi eq, %64, %70 : vector<128x8xi32>
    %c3_i32 = arith.constant 3 : i32
    %72 = vector.broadcast %c3_i32 : i32 to vector<128x8xi32>
    %73 = arith.cmpi eq, %64, %72 : vector<128x8xi32>
    %cst_31 = arith.constant 0.000000e+00 : f32
    %74 = vector.shape_cast %30 : vector<128x1xf32> to vector<128x1xf32>
    %75 = vector.broadcast %74 : vector<128x1xf32> to vector<128x8xf32>
    %76 = vector.broadcast %cst_31 : f32 to vector<128x8xf32>
    %77 = arith.select %73, %75, %76 : vector<128x8xi1>, vector<128x8xf32>
    %78 = vector.shape_cast %63 : vector<128x1xf32> to vector<128x1xf32>
    %79 = vector.broadcast %78 : vector<128x1xf32> to vector<128x8xf32>
    %80 = arith.select %71, %79, %77 : vector<128x8xi1>, vector<128x8xf32>
    %81 = vector.shape_cast %59 : vector<128x1xf32> to vector<128x1xf32>
    %82 = vector.broadcast %81 : vector<128x1xf32> to vector<128x8xf32>
    %83 = arith.select %69, %82, %80 : vector<128x8xi1>, vector<128x8xf32>
    %84 = vector.shape_cast %67 : vector<128x1xf32> to vector<128x1xf32>
    %85 = vector.broadcast %84 : vector<128x1xf32> to vector<128x8xf32>
    %86 = arith.select %66, %85, %83 : vector<128x8xi1>, vector<128x8xf32>
    %c0_32 = arith.constant 0 : index
    %c0_33 = arith.constant 0 : index
    %87 = vector.load %arg9[%c0_32, %c0_33] : memref<128x8xf32, #tpu.memory_space<vmem>>, vector<128x8xf32>
    tpu.vector_store %arg9[%c0_32, %c0_33], %86 {strides = array<i32>} : memref<128x8xf32, #tpu.memory_space<vmem>>, vector<128x8xf32>,
    return
  }
  func.func @transform_0(%arg0: i32) -> (i32, i32) {
    %c0_i32 = arith.constant 0 : i32
    %c0_i32_0 = arith.constant 0 : i32
    return %arg0, %c0_i32 : i32, i32
  }
  func.func @transform_1(%arg0: i32) -> (i32, i32) {
    %c0_i32 = arith.constant 0 : i32
    %c0_i32_0 = arith.constant 0 : i32
    return %arg0, %c0_i32 : i32, i32
  }
  func.func @transform_2(%arg0: i32) -> (i32, i32) {
    %c0_i32 = arith.constant 0 : i32
    %c0_i32_0 = arith.constant 0 : i32
    %c0_i32_1 = arith.constant 0 : i32
    return %c0_i32, %c0_i32_0 : i32, i32
  }
  func.func @transform_3(%arg0: i32) -> (i32, i32) {
    %c0_i32 = arith.constant 0 : i32
    %c0_i32_0 = arith.constant 0 : i32
    %c0_i32_1 = arith.constant 0 : i32
    return %c0_i32, %c0_i32_0 : i32, i32
  }
  func.func @transform_4(%arg0: i32) -> (i32, i32) {
    %c0_i32 = arith.constant 0 : i32
    %c0_i32_0 = arith.constant 0 : i32
    %c0_i32_1 = arith.constant 0 : i32
    return %c0_i32, %c0_i32_0 : i32, i32
  }
  func.func @transform_5(%arg0: i32) -> (i32, i32) {
    %c0_i32 = arith.constant 0 : i32
    %c0_i32_0 = arith.constant 0 : i32
    %c0_i32_1 = arith.constant 0 : i32
    return %c0_i32, %c0_i32_0 : i32, i32
  }
  func.func @transform_6(%arg0: i32) -> (i32, i32) {
    %c0_i32 = arith.constant 0 : i32
    %c0_i32_0 = arith.constant 0 : i32
    %c0_i32_1 = arith.constant 0 : i32
    return %c0_i32, %c0_i32_0 : i32, i32
  }
  func.func @transform_7(%arg0: i32) -> (i32, i32) {
    %c0_i32 = arith.constant 0 : i32
    %c0_i32_0 = arith.constant 0 : i32
    %c0_i32_1 = arith.constant 0 : i32
    return %c0_i32, %c0_i32_0 : i32, i32
  }
  func.func @transform_8(%arg0: i32) -> (i32, i32) {
    %c0_i32 = arith.constant 0 : i32
    %c0_i32_0 = arith.constant 0 : i32
    return %arg0, %c0_i32 : i32, i32
  }
}

</mosaic_0001>

<bundles_post_ra>
// kernel: tpu_custom_call.1
= control target key start
LH: loop header
LB: loop body
LE: loop exit
PB: predicated region body
PF: predicated region fallthrough
CT: control target
= control target key end

     0   :  { %13 = vsyncpa [#allocation3], 0  ;;  %s3343_s0 = inlined_call_operand.hbm [shape: f32[8,8], index: 0, kind: input, shape index: {}]   ;;  %s3344_s1 = inlined_call_operand.hbm [shape: f32[8,128], index: 1, kind: input, shape index: {}]   ;;  %s3345_s2 = inlined_call_operand.hbm [shape: f32[8,128], index: 2, kind: input, shape index: {}]   ;;  %s3346_s3 = inlined_call_operand.vmem [shape: f32[1,128], index: 3, kind: input, shape index: {}]   ;;  %s3347_s4 = inlined_call_operand.hbm [shape: f32[128,128], index: 4, kind: input, shape index: {}]   ;;  %s3348_s5 = inlined_call_operand.vmem [shape: f32[1,128], index: 5, kind: input, shape index: {}]   ;;  %s3349_s6 = inlined_call_operand.hbm [shape: f32[128,128], index: 6, kind: input, shape index: {}]   ;;  %s3350_s7 = inlined_call_operand.vmem [shape: f32[1,128], index: 7, kind: input, shape index: {}]   ;;  %s3351_s8 = inlined_call_operand.hbm [shape: f32[8,8], index: 8, kind: output, shape index: {}]  }
   0x1   :  { %14 = vsyncpa [#allocation6], 0 }
   0x2   :  { %15 = vsyncpa [#allocation9], 0 }
   0x3   :  { %16 = vsyncpa [#allocation4], 0 }
   0x4   :  { %21 = vsyncadd [#allocation3], 1920  ;;  %s2071_s27 = smov [#allocation2]   ;;  %s1931_s9 = scalar_lea.hbm %s3343_s0, 128 }
   0x5   :  { %s22_s28 = sshll.u32 %s2071_s27, 4  ;;  %p1932_p0 = scmp.ne.s32.totalorder %s3343_s0, %s1931_s9  ;;  %s23_s28 = int_to_ptr.vmem [resolvable:$true] %s22_s28 }
   0x6   :  { %p1935_p1 = scmp.lt.u32.totalorder %s1931_s9, %s3343_s0 }
   0x8   :  { %p1937_p2 = pnand %p1935_p1, %p1932_p0 }
   0xa   :  { %1940 = shalt.err (!%p1937_p2)
}
   0xb   :  { %s1941_s14 = scalar_lea.vmem %s23_s28, 128  ;;  %s1945_s15 = scalar_lea.vmem %s23_s28, 2048 }
   0xc   :  { %p1942_p3 = scmp.ne.s32.totalorder %s23_s28, %s1941_s14  ;;  %p1946_p4 = scmp.lt.s32.totalorder %s23_s28, %s23_s28 }
   0xd   :  { %p1947_p5 = scmp.lt.s32.totalorder %s1945_s15, %s1941_s14 }
   0xf   :  { %p1948_p6 = por %p1947_p5, %p1946_p4 }
  0x11   :  { %p1949_p7 = pnand %p1948_p6, %p1942_p3 }
  0x13   :  { %1952 = shalt.err (!%p1949_p7)
}
  0x14   :  { %s2072_s16 = smov 128   ;;  %s2073_s17 = smov 8  }
  0x15   :  { %28 = dma.hbm_to_vmem [thread:$0]  %s3343_s0, 128, %s23_s28, [#allocation3], %s2072_s16, %s2072_s16, %s2073_s17  }
  0x16   :  { %33 = vsyncadd [#allocation6], 1920  ;;  %s2074_s20 = smov [#allocation5]   ;;  %s2075_s22 = smov [#allocation8]  }
  0x17   :  { %s34_s21 = sshll.u32 %s2074_s20, 4  ;;  %s58_s23 = sshll.u32 %s2075_s22, 4  ;;  %s35_s21 = int_to_ptr.vmem [resolvable:$true] %s34_s21  ;;  %s2139_s23 = int_to_ptr.vmem [resolvable:$true] %s58_s23 }
  0x18   :  { %s1953_s26 = scalar_lea.hbm %s3344_s1, 128 }
  0x19   :  { %p1954_p8 = scmp.ne.s32.totalorder %s3344_s1, %s1953_s26  ;;  %p1957_p9 = scmp.lt.u32.totalorder %s1953_s26, %s3344_s1 }
  0x1b   :  { %p1959_p10 = pnand %p1957_p9, %p1954_p8 }
  0x1d   :  { %1962 = shalt.err (!%p1959_p10)
}
  0x1e   :  { %s1963_s0 = scalar_lea.vmem %s35_s21, 128  ;;  %s1967_s28 = scalar_lea.vmem %s35_s21, 2048 }
  0x1f   :  { %p1964_p11 = scmp.ne.s32.totalorder %s35_s21, %s1963_s0  ;;  %p1968_p12 = scmp.lt.s32.totalorder %s35_s21, %s35_s21 }
  0x20   :  { %p1969_p13 = scmp.lt.s32.totalorder %s1967_s28, %s1963_s0 }
  0x22   :  { %p1970_p0 = por %p1969_p13, %p1968_p12 }
  0x24   :  { %p1971_p1 = pnand %p1970_p0, %p1964_p11 }
  0x26   :  { %1974 = shalt.err (!%p1971_p1)
}
  0x27   :  { %40 = dma.hbm_to_vmem [thread:$0]  %s3344_s1, 128, %s35_s21, [#allocation6], %s2072_s16, %s2072_s16, %s2073_s17  }
  0x28   :  { %s1975_s14 = scalar_lea.hbm %s3347_s4, 2048 }
  0x29   :  { %p1976_p2 = scmp.ne.s32.totalorder %s3347_s4, %s1975_s14  ;;  %p1979_p3 = scmp.lt.u32.totalorder %s1975_s14, %s3347_s4 }
  0x2b   :  { %p1981_p4 = pnand %p1979_p3, %p1976_p2 }
  0x2d   :  { %1984 = shalt.err (!%p1981_p4)
}
  0x2e   :  { %s1985_s22 = scalar_lea.vmem %s2139_s23, 2048  ;;  %p1990_p6 = scmp.lt.s32.totalorder %s2139_s23, %s2139_s23 }
  0x2f   :  { %p1986_p5 = scmp.ne.s32.totalorder %s2139_s23, %s1985_s22  ;;  %p1991_p7 = scmp.lt.s32.totalorder %s1985_s22, %s1985_s22 }
  0x31   :  { %p1992_p8 = por %p1991_p7, %p1990_p6 }
  0x33   :  { %p1993_p9 = pnand %p1992_p8, %p1986_p5 }
  0x35   :  { %1996 = shalt.err (!%p1993_p9)
}
  0x36   :  { %64 = dma.hbm_to_vmem [thread:$0]  %s3347_s4, 2048, %s2139_s23, [#allocation9], %s2072_s16, %s2072_s16, %s2073_s17  }
  0x37   :  { %s2076_s24 = smov [#allocation7]   ;;  %s2077_s26 = smov [#allocation10]  }
  0x38   :  { %s47_s25 = sshll.u32 %s2076_s24, 4  ;;  %s72_s27 = sshll.u32 %s2077_s26, 4  ;;  %s48_s25 = int_to_ptr.vmem [resolvable:$true] %s47_s25  ;;  %s2176_s27 = int_to_ptr.vmem [resolvable:$true] %s72_s27 }
  0x39   :  { %s1997_s9 = scalar_lea.hbm %s3345_s2, 128 }
  0x3a   :  { %p1998_p10 = scmp.ne.s32.totalorder %s3345_s2, %s1997_s9  ;;  %p2001_p11 = scmp.lt.u32.totalorder %s1997_s9, %s3345_s2 }
  0x3c   :  { %p2003_p12 = pnand %p2001_p11, %p1998_p10 }
  0x3e   :  { %2006 = shalt.err (!%p2003_p12)
}
  0x3f   :  { %s2007_s4 = scalar_lea.vmem %s48_s25, 128  ;;  %p2012_p0 = scmp.lt.s32.totalorder %s48_s25, %s48_s25 }
  0x40   :  { %p2008_p13 = scmp.ne.s32.totalorder %s48_s25, %s2007_s4  ;;  %p2013_p1 = scmp.lt.s32.totalorder %s2007_s4, %s2007_s4 }
  0x42   :  { %p2014_p2 = por %p2013_p1, %p2012_p0 }
  0x44   :  { %p2015_p3 = pnand %p2014_p2, %p2008_p13 }
  0x46   :  { %2018 = shalt.err (!%p2015_p3)
}
  0x47   :  { %50 = dma.hbm_to_vmem [thread:$0]  %s3345_s2, 128, %s48_s25, [#allocation6]  }
  0x48   :  { %s2019_s15 = scalar_lea.hbm %s3349_s6, 2048 }
  0x49   :  { %p2020_p4 = scmp.ne.s32.totalorder %s3349_s6, %s2019_s15  ;;  %p2023_p5 = scmp.lt.u32.totalorder %s2019_s15, %s3349_s6 }
  0x4b   :  { %p2025_p6 = pnand %p2023_p5, %p2020_p4 }
  0x4d   :  { %2028 = shalt.err (!%p2025_p6)
}
  0x4e   :  { %s2029_s1 = scalar_lea.vmem %s2176_s27, 2048  ;;  %p2034_p8 = scmp.lt.s32.totalorder %s2176_s27, %s2176_s27 }
  0x4f   :  { %p2030_p7 = scmp.ne.s32.totalorder %s2176_s27, %s2029_s1  ;;  %p2035_p9 = scmp.lt.s32.totalorder %s2029_s1, %s2029_s1 }
  0x51   :  { %p2036_p10 = por %p2035_p9, %p2034_p8 }
  0x53   :  { %p2037_p11 = pnand %p2036_p10, %p2030_p7 }
  0x55   :  { %2040 = shalt.err (!%p2037_p11)
}
  0x56   :  { %78 = dma.hbm_to_vmem [thread:$0]  %s3349_s6, 2048, %s2176_s27, [#allocation9], %s2072_s16, %s2072_s16, %s2073_s17  }
  0x57   :  { %2063 = dma.done.wait [#allocation3], 2048  }
  0x58   :  { %2064 = vsyncadd [#allocation3], 4294965248 }
  0x59   :  { %2065 = dma.done.wait [#allocation6], 2176  }
  0x5a   :  { %2066 = vsyncadd [#allocation6], 4294965120 }
  0x5b   :  { %2067 = dma.done.wait [#allocation9], 4096  }
  0x5c   :  { %2068 = vsyncadd [#allocation9], 4294963200  ;;  %vm120_vm0 = vcmask 64512   ;;  %v112_v0 = vld [vmem:[#allocation7] sm:$0xff]  ;;  %v97_v2 = vld [vmem:[#allocation2 + $0x8] sm:$0xff] }
  0x5d   :  { %v96_v1 = vld [vmem:[#allocation2] sm:$0xff]  ;;  %1625 = vmatprep.subr.mxu0 %v112_v0  ;;  %v98_v3 = vld [vmem:[#allocation2 + $0x10] sm:$0xff]  ;;  %v99_v4 = vld [vmem:[#allocation2 + $0x18] sm:$0xff] }
  0x5e   :  { %1627 = vmatprep.mubr.msk.f32.mxu0 %vm120_vm0, %v96_v1  ;;  %1626 = vmatpush3.msra.mxu0 %v112_v0  ;;  %v100_v5 = vld [vmem:[#allocation2 + $0x20] sm:$0xff]  ;;  %v330_v6 = vld [vmem:[#allocation8] sm:$0xff]  ;;  %v331_v7 = vld [vmem:[#allocation8 + $0x8] sm:$0xff] }
  0x5f   :  { %1628 = vmatmul.mubr.msk.f32.vlgmr.msra.gmra.mrb[0].mxu0 %vm120_vm0, %v97_v2  ;;  %v332_v8 = vld [vmem:[#allocation8 + $0x10] sm:$0xff]  ;;  %v333_v9 = vld [vmem:[#allocation8 + $0x18] sm:$0xff]  ;;  %v1763_v10 = vpack.c.bf16 %v331_v7, %v330_v6  ;;  %v101_v12 = vld [vmem:[#allocation2 + $0x28] sm:$0xff] }
  0x60   :  { %1630 = vmatprep.mubr.msk.f32.mxu0 %vm120_vm0, %v98_v3  ;;  %v1767_v11 = vpack.c.bf16 %v333_v9, %v332_v8  ;;  %v334_v13 = vld [vmem:[#allocation8 + $0x20] sm:$0xff]  ;;  %v335_v14 = vld [vmem:[#allocation8 + $0x28] sm:$0xff]  ;;  %v103_v17 = vld [vmem:[#allocation2 + $0x38] sm:$0xff] }
  0x61   :  { %v102_v15 = vld [vmem:[#allocation2 + $0x30] sm:$0xff]  ;;  %1764 = vmatprep.subr.bf16.mxu1 %v1763_v10  ;;  %v1771_v16 = vpack.c.bf16 %v335_v14, %v334_v13  ;;  %v336_v18 = vld [vmem:[#allocation8 + $0x30] sm:$0xff]  ;;  %v337_v19 = vld [vmem:[#allocation8 + $0x38] sm:$0xff] }
  0x62   :  { %1766 = vmatpush3.bf16.msra.mxu1 %v1763_v10  ;;  %v104_v20 = vld [vmem:[#allocation2 + $0x40] sm:$0xff]  ;;  %v1775_v21 = vpack.c.bf16 %v337_v19, %v336_v18  ;;  %v105_v22 = vld [vmem:[#allocation2 + $0x48] sm:$0xff]  ;;  %v339_v24 = vld [vmem:[#allocation8 + $0x48] sm:$0xff] }
  0x63   :  { %1631 = vmatmul.mubr.msk.f32.gmra.mrb[2].mxu0 %vm120_vm0, %v99_v4  ;;  %1768 = vmatprep.subr.bf16.mxu1 %v1767_v11  ;;  %v338_v23 = vld [vmem:[#allocation8 + $0x40] sm:$0xff]  ;;  %v106_v25 = vld [vmem:[#allocation2 + $0x50] sm:$0xff]  ;;  %v107_v27 = vld [vmem:[#allocation2 + $0x58] sm:$0xff] }
  0x64   :  { %1633 = vmatprep.mubr.msk.f32.mxu0 %vm120_vm0, %v100_v5  ;;  %v1779_v26 = vpack.c.bf16 %v339_v24, %v338_v23  ;;  %v340_v28 = vld [vmem:[#allocation8 + $0x50] sm:$0xff]  ;;  %v341_v29 = vld [vmem:[#allocation8 + $0x58] sm:$0xff]  ;;  %v109_v32 = vld [vmem:[#allocation2 + $0x68] sm:$0xff] }
  0x65   :  { %v108_v30 = vld [vmem:[#allocation2 + $0x60] sm:$0xff]  ;;  %v1783_v31 = vpack.c.bf16 %v341_v29, %v340_v28  ;;  %v342_v33 = vld [vmem:[#allocation8 + $0x60] sm:$0xff]  ;;  %v343_v34 = vld [vmem:[#allocation8 + $0x68] sm:$0xff] }
  0x66   :  { %1770 = vmatpush3.bf16.msra.mxu1 %v1767_v11  ;;  %v110_v35 = vld [vmem:[#allocation2 + $0x70] sm:$0xff]  ;;  %v1787_v36 = vpack.c.bf16 %v343_v34, %v342_v33  ;;  %v111_v37 = vld [vmem:[#allocation2 + $0x78] sm:$0xff]  ;;  %v345_v39 = vld [vmem:[#allocation8 + $0x78] sm:$0xff] }
  0x67   :  { %1634 = vmatmul.mubr.msk.f32.gmra.mrb[4].mxu0 %vm120_vm0, %v101_v12  ;;  %1772 = vmatprep.subr.bf16.mxu1 %v1771_v16  ;;  %v344_v38 = vld [vmem:[#allocation8 + $0x70] sm:$0xff]  ;;  %v514_v41 = vld [vmem:[#allocation10] sm:$0xff]  ;;  %v515_v42 = vld [vmem:[#allocation10 + $0x8] sm:$0xff] }
  0x68   :  { %1636 = vmatprep.mubr.msk.f32.mxu0 %vm120_vm0, %v102_v15  ;;  %v1791_v40 = vpack.c.bf16 %v345_v39, %v344_v38  ;;  %v516_v43 = vld [vmem:[#allocation10 + $0x10] sm:$0xff]  ;;  %v1795_v44 = vpack.c.bf16 %v515_v42, %v514_v41  ;;  %v517_v45 = vld [vmem:[#allocation10 + $0x18] sm:$0xff]  ;;  %v518_v47 = vld [vmem:[#allocation10 + $0x20] sm:$0xff] }
  0x69   :  { %v1799_v46 = vpack.c.bf16 %v517_v45, %v516_v43  ;;  %v519_v48 = vld [vmem:[#allocation10 + $0x28] sm:$0xff]  ;;  %v520_v50 = vld [vmem:[#allocation10 + $0x30] sm:$0xff]  ;;  %v521_v51 = vld [vmem:[#allocation10 + $0x38] sm:$0xff] }
  0x6a   :  { %1774 = vmatpush3.bf16.msra.mxu1 %v1771_v16  ;;  %1796 = vmatprep.subr.bf16.mxu0 %v1795_v44  ;;  %v1803_v49 = vpack.c.bf16 %v519_v48, %v518_v47  ;;  %v1807_v52 = vpack.c.bf16 %v521_v51, %v520_v50  ;;  %v522_v53 = vld [vmem:[#allocation10 + $0x40] sm:$0xff]  ;;  %v523_v54 = vld [vmem:[#allocation10 + $0x48] sm:$0xff]  ;;  %v524_v56 = vld [vmem:[#allocation10 + $0x50] sm:$0xff] }
  0x6b   :  { %1637 = vmatmul.mubr.msk.f32.gmra.mrb[6].mxu0 %vm120_vm0, %v103_v17  ;;  %1776 = vmatprep.subr.bf16.mxu1 %v1775_v21  ;;  %v1811_v55 = vpack.c.bf16 %v523_v54, %v522_v53  ;;  %v525_v57 = vld [vmem:[#allocation10 + $0x58] sm:$0xff]  ;;  %v526_v59 = vld [vmem:[#allocation10 + $0x60] sm:$0xff]  ;;  %v527_v60 = vld [vmem:[#allocation10 + $0x68] sm:$0xff] }
  0x6c   :  { %1639 = vmatprep.mubr.msk.f32.mxu0 %vm120_vm0, %v104_v20  ;;  %1798 = vmatpush3.bf16.msra.mxu0 %v1795_v44  ;;  %v1815_v58 = vpack.c.bf16 %v525_v57, %v524_v56  ;;  %v1819_v61 = vpack.c.bf16 %v527_v60, %v526_v59  ;;  %v1525_v62 = vld [vmem:[%s3346_s3] ss:$0 sm:$0xff]  ;;  %v528_v47 = vld [vmem:[#allocation10 + $0x70] sm:$0xff] }
  0x6d   :  { %1800 = vmatprep.subr.bf16.mxu0 %v1799_v46  ;;  %v529_v48 = vld [vmem:[#allocation10 + $0x78] sm:$0xff] }
  0x6e   :  { %1778 = vmatpush3.bf16.msra.mxu1 %v1775_v21  ;;  %v1542_v50 = vld [vmem:[%s3348_s5] ss:$0 sm:$0xff] }
  0x6f   :  { %1640 = vmatmul.mubr.msk.f32.gmra.mrb[8].mxu0 %vm120_vm0, %v105_v22  ;;  %1780 = vmatprep.subr.bf16.mxu1 %v1779_v26 }
  0x70   :  { %1642 = vmatprep.mubr.msk.f32.mxu0 %vm120_vm0, %v106_v25  ;;  %1802 = vmatpush3.bf16.msra.mxu0 %v1799_v46 }
  0x71   :  { %1804 = vmatprep.subr.bf16.mxu0 %v1803_v49 }
  0x72   :  { %1782 = vmatpush3.bf16.msra.mxu1 %v1779_v26 }
  0x73   :  { %1643 = vmatmul.mubr.msk.f32.gmra.mrb[10].mxu0 %vm120_vm0, %v107_v27  ;;  %1784 = vmatprep.subr.bf16.mxu1 %v1783_v31 }
  0x74   :  { %1645 = vmatprep.mubr.msk.f32.mxu0 %vm120_vm0, %v108_v30  ;;  %1806 = vmatpush3.bf16.msra.mxu0 %v1803_v49  ;;  %v1823_v49 = vpack.c.bf16 %v529_v48, %v528_v47 }
  0x75   :  { %1808 = vmatprep.subr.bf16.mxu0 %v1807_v52 }
  0x76   :  { %1786 = vmatpush3.bf16.msra.mxu1 %v1783_v31 }
  0x77   :  { %1646 = vmatmul.mubr.msk.f32.gmra.mrb[12].mxu0 %vm120_vm0, %v109_v32  ;;  %1788 = vmatprep.subr.bf16.mxu1 %v1787_v36 }
  0x78   :  { %1648 = vmatprep.mubr.msk.f32.mxu0 %vm120_vm0, %v110_v35  ;;  %1810 = vmatpush3.bf16.msra.mxu0 %v1807_v52 }
  0x79   :  { %1812 = vmatprep.subr.bf16.mxu0 %v1811_v55 }
  0x7a   :  { %1790 = vmatpush3.bf16.msra.mxu1 %v1787_v36 }
  0x7b   :  { %1649 = vmatmul.mubr.msk.f32.gmra.mrb[14].mxu0 %vm120_vm0, %v111_v37  ;;  %1792 = vmatprep.subr.bf16.mxu1 %v1791_v40 }
  0x7c   :  { %1814 = vmatpush3.bf16.msra.mxu0 %v1811_v55 }
  0x7d   :  { %1816 = vmatprep.subr.bf16.mxu0 %v1815_v58 }
  0x7e   :  { %1794 = vmatpush3.bf16.msra.mxu1 %v1791_v40 }
  0x80   :  { %1818 = vmatpush3.bf16.msra.mxu0 %v1815_v58 }
  0x81   :  { %1820 = vmatprep.subr.bf16.mxu0 %v1819_v61 }
  0x84   :  { %1822 = vmatpush3.bf16.msra.mxu0 %v1819_v61 }
  0x85   :  { %1824 = vmatprep.subr.bf16.mxu0 %v1823_v49 }
  0x88   :  { %1826 = vmatpush3.bf16.msra.mxu0 %v1823_v49  ;;  %v945_v49 = vld [vmem:[#allocation5 + $0x18] sm:$0xff] }
 0x132   :  { %v1629_v63 = vpop.f32.mrb[0].mxu0 }
 0x133   :  { %v241_v0 = vadd.f32 %v1629_v63, %v1525_v62  ;;  %v235_v1 = vpop.f32.mrb[1].mxu0 }
 0x134   :  { %v236_v2 = vadd.f32 %v1525_v62, %v235_v1 }
 0x135   :  { %v315_v5 = vmax.f32 %v241_v0, 0.0 }
 0x136   :  { %v1632_v3 = vpop.f32.mrb[2].mxu0  ;;  %v314_v4 = vmax.f32 %v236_v2, 0.0 }
 0x137   :  { %v251_v6 = vadd.f32 %v1632_v3, %v1525_v62  ;;  %v245_v7 = vpop.f32.mrb[3].mxu0 }
 0x138   :  { %v246_v8 = vadd.f32 %v1525_v62, %v245_v7  ;;  %1683 = vmatprep.mubr.f32.mxu1 %v314_v4 }
 0x139   :  { %1684 = vmatmul.mubr.f32.vlgmr.msra.gmra.mrb[0].mxu1 %v315_v5  ;;  %v317_v11 = vmax.f32 %v251_v6, 0.0 }
 0x13a   :  { %v316_v9 = vmax.f32 %v246_v8, 0.0  ;;  %v1635_v10 = vpop.f32.mrb[4].mxu0 }
 0x13b   :  { %v261_v12 = vadd.f32 %v1635_v10, %v1525_v62  ;;  %v255_v13 = vpop.f32.mrb[5].mxu0 }
 0x13c   :  { %v256_v14 = vadd.f32 %v1525_v62, %v255_v13  ;;  %1686 = vmatprep.mubr.f32.mxu1 %v316_v9 }
 0x13d   :  { %v319_v15 = vmax.f32 %v261_v12, 0.0  ;;  %1687 = vmatmul.mubr.f32.gmra.mrb[2].mxu1 %v317_v11 }
 0x13e   :  { %v318_v16 = vmax.f32 %v256_v14, 0.0  ;;  %v1638_v17 = vpop.f32.mrb[6].mxu0 }
 0x13f   :  { %v271_v18 = vadd.f32 %v1638_v17, %v1525_v62  ;;  %v265_v19 = vpop.f32.mrb[7].mxu0 }
 0x140   :  { %v266_v20 = vadd.f32 %v1525_v62, %v265_v19  ;;  %1689 = vmatprep.mubr.f32.mxu1 %v318_v16 }
 0x141   :  { %v321_v21 = vmax.f32 %v271_v18, 0.0  ;;  %1690 = vmatmul.mubr.f32.gmra.mrb[4].mxu1 %v319_v15 }
 0x142   :  { %v320_v22 = vmax.f32 %v266_v20, 0.0  ;;  %v1641_v23 = vpop.f32.mrb[8].mxu0 }
 0x143   :  { %v281_v24 = vadd.f32 %v1641_v23, %v1525_v62  ;;  %v275_v25 = vpop.f32.mrb[9].mxu0 }
 0x144   :  { %v276_v26 = vadd.f32 %v1525_v62, %v275_v25  ;;  %1692 = vmatprep.mubr.f32.mxu1 %v320_v22 }
 0x145   :  { %v323_v27 = vmax.f32 %v281_v24, 0.0  ;;  %1693 = vmatmul.mubr.f32.gmra.mrb[6].mxu1 %v321_v21 }
 0x146   :  { %v322_v28 = vmax.f32 %v276_v26, 0.0  ;;  %v1644_v29 = vpop.f32.mrb[10].mxu0 }
 0x147   :  { %v291_v30 = vadd.f32 %v1644_v29, %v1525_v62  ;;  %v285_v31 = vpop.f32.mrb[11].mxu0 }
 0x148   :  { %v286_v32 = vadd.f32 %v1525_v62, %v285_v31  ;;  %1695 = vmatprep.mubr.f32.mxu1 %v322_v28 }
 0x149   :  { %v325_v33 = vmax.f32 %v291_v30, 0.0  ;;  %1696 = vmatmul.mubr.f32.gmra.mrb[8].mxu1 %v323_v27 }
 0x14a   :  { %v324_v34 = vmax.f32 %v286_v32, 0.0  ;;  %v1647_v35 = vpop.f32.mrb[12].mxu0 }
 0x14b   :  { %v301_v36 = vadd.f32 %v1647_v35, %v1525_v62  ;;  %v295_v37 = vpop.f32.mrb[13].mxu0  ;;  %v682_v35 = vlaneseq }
 0x14c   :  { %v296_v38 = vadd.f32 %v1525_v62, %v295_v37  ;;  %1698 = vmatprep.mubr.f32.mxu1 %v324_v34  ;;  %v2237_v37 = vld [vmem:[%s3350_s7] ss:$0 sm:$0xff] }
 0x14d   :  { %v327_v39 = vmax.f32 %v301_v36, 0.0  ;;  %1699 = vmatmul.mubr.f32.gmra.mrb[10].mxu1 %v325_v33  ;;  %v2232_v36 = vand.u32 127, %v682_v35 }
 0x14e   :  { %v326_v40 = vmax.f32 %v296_v38, 0.0  ;;  %v1650_v41 = vpop.f32.mrb[14].mxu0 }
 0x14f   :  { %v311_v42 = vadd.f32 %v1650_v41, %v1525_v62  ;;  %v305_v43 = vpop.f32.mrb[15].mxu0  ;;  %vm684_vm1 = vcmp.lt.s32.totalorder %v2232_v36, 6  ;;  %v943_v41 = vld [vmem:[#allocation5 + $0x8] sm:$0xff]  ;;  %vm701_vm2 = vcmp.eq.s32.totalorder %v2232_v36, 6 }
 0x150   :  { %v306_v44 = vadd.f32 %v1525_v62, %v305_v43  ;;  %1701 = vmatprep.mubr.f32.mxu1 %v326_v40 }
 0x151   :  { %v329_v45 = vmax.f32 %v311_v42, 0.0  ;;  %1702 = vmatmul.mubr.f32.gmra.mrb[12].mxu1 %v327_v39 }
 0x152   :  { %v328_v46 = vmax.f32 %v306_v44, 0.0 }
 0x154   :  { %1704 = vmatprep.mubr.f32.mxu1 %v328_v46 }
 0x155   :  { %1705 = vmatmul.mubr.f32.gmra.mrb[14].mxu1 %v329_v45 }
 0x20c   :  { %v1685_v51 = vpop.f32.mrb[0].mxu1 }
 0x20d   :  { %v425_v52 = vadd.f32 %v1685_v51, %v1542_v50  ;;  %v419_v53 = vpop.f32.mrb[1].mxu1 }
 0x20e   :  { %v420_v54 = vadd.f32 %v1542_v50, %v419_v53 }
 0x20f   :  { %v499_v57 = vmax.f32 %v425_v52, 0.0 }
 0x210   :  { %v498_v55 = vmax.f32 %v420_v54, 0.0  ;;  %v1688_v56 = vpop.f32.mrb[2].mxu1 }
 0x211   :  { %v435_v58 = vadd.f32 %v1688_v56, %v1542_v50  ;;  %v429_v59 = vpop.f32.mrb[3].mxu1 }
 0x212   :  { %v430_v60 = vadd.f32 %v1542_v50, %v429_v59  ;;  %1739 = vmatprep.mubr.f32.mxu0 %v498_v55  ;;  %v944_v59 = vld [vmem:[#allocation5 + $0x10] sm:$0xff] }
 0x213   :  { %1740 = vmatmul.mubr.f32.vlgmr.msra.gmra.mrb[16].mxu0 %v499_v57  ;;  %v501_v63 = vmax.f32 %v435_v58, 0.0 }
 0x214   :  { %v500_v61 = vmax.f32 %v430_v60, 0.0  ;;  %v1691_v62 = vpop.f32.mrb[4].mxu1 }
 0x215   :  { %v445_v0 = vadd.f32 %v1691_v62, %v1542_v50  ;;  %v439_v1 = vpop.f32.mrb[5].mxu1 }
 0x216   :  { %v440_v2 = vadd.f32 %v1542_v50, %v439_v1  ;;  %1742 = vmatprep.mubr.f32.mxu0 %v500_v61  ;;  %v946_v61 = vld [vmem:[#allocation5 + $0x20] sm:$0xff] }
 0x217   :  { %v503_v3 = vmax.f32 %v445_v0, 0.0  ;;  %1743 = vmatmul.mubr.f32.gmra.mrb[18].mxu0 %v501_v63 }
 0x218   :  { %v502_v4 = vmax.f32 %v440_v2, 0.0  ;;  %v1694_v5 = vpop.f32.mrb[6].mxu1 }
 0x219   :  { %v455_v6 = vadd.f32 %v1694_v5, %v1542_v50  ;;  %v449_v7 = vpop.f32.mrb[7].mxu1  ;;  %v947_v5 = vld [vmem:[#allocation5 + $0x28] sm:$0xff] }
 0x21a   :  { %v450_v8 = vadd.f32 %v1542_v50, %v449_v7  ;;  %1745 = vmatprep.mubr.f32.mxu0 %v502_v4  ;;  %v948_v7 = vld [vmem:[#allocation5 + $0x30] sm:$0xff] }
 0x21b   :  { %v505_v9 = vmax.f32 %v455_v6, 0.0  ;;  %1746 = vmatmul.mubr.f32.gmra.mrb[20].mxu0 %v503_v3 }
 0x21c   :  { %v504_v10 = vmax.f32 %v450_v8, 0.0  ;;  %v1697_v11 = vpop.f32.mrb[8].mxu1 }
 0x21d   :  { %v465_v12 = vadd.f32 %v1697_v11, %v1542_v50  ;;  %v459_v13 = vpop.f32.mrb[9].mxu1 }
 0x21e   :  { %v460_v14 = vadd.f32 %v1542_v50, %v459_v13  ;;  %1748 = vmatprep.mubr.f32.mxu0 %v504_v10 }
 0x21f   :  { %v507_v15 = vmax.f32 %v465_v12, 0.0  ;;  %1749 = vmatmul.mubr.f32.gmra.mrb[22].mxu0 %v505_v9 }
 0x220   :  { %v506_v16 = vmax.f32 %v460_v14, 0.0  ;;  %v1700_v17 = vpop.f32.mrb[10].mxu1 }
 0x221   :  { %v475_v18 = vadd.f32 %v1700_v17, %v1542_v50  ;;  %v469_v19 = vpop.f32.mrb[11].mxu1  ;;  %v950_v17 = vld [vmem:[#allocation5 + $0x40] sm:$0xff] }
 0x222   :  { %v470_v20 = vadd.f32 %v1542_v50, %v469_v19  ;;  %1751 = vmatprep.mubr.f32.mxu0 %v506_v16 }
 0x223   :  { %v509_v21 = vmax.f32 %v475_v18, 0.0  ;;  %1752 = vmatmul.mubr.f32.gmra.mrb[24].mxu0 %v507_v15  ;;  %v949_v15 = vld [vmem:[#allocation5 + $0x38] sm:$0xff] }
 0x224   :  { %v508_v22 = vmax.f32 %v470_v20, 0.0  ;;  %v1703_v23 = vpop.f32.mrb[12].mxu1 }
 0x225   :  { %v485_v24 = vadd.f32 %v1703_v23, %v1542_v50  ;;  %v479_v25 = vpop.f32.mrb[13].mxu1 }
 0x226   :  { %v480_v26 = vadd.f32 %v1542_v50, %v479_v25  ;;  %1754 = vmatprep.mubr.f32.mxu0 %v508_v22 }
 0x227   :  { %v511_v27 = vmax.f32 %v485_v24, 0.0  ;;  %1755 = vmatmul.mubr.f32.gmra.mrb[26].mxu0 %v509_v21 }
 0x228   :  { %v510_v28 = vmax.f32 %v480_v26, 0.0  ;;  %v1706_v29 = vpop.f32.mrb[14].mxu1 }
 0x229   :  { %v495_v30 = vadd.f32 %v1706_v29, %v1542_v50  ;;  %v489_v31 = vpop.f32.mrb[15].mxu1  ;;  %v952_v29 = vld [vmem:[#allocation5 + $0x50] sm:$0xff] }
 0x22a   :  { %v490_v32 = vadd.f32 %v1542_v50, %v489_v31  ;;  %1757 = vmatprep.mubr.f32.mxu0 %v510_v28  ;;  %v942_v50 = vld [vmem:[#allocation5] sm:$0xff] }
 0x22b   :  { %v513_v33 = vmax.f32 %v495_v30, 0.0  ;;  %1758 = vmatmul.mubr.f32.gmra.mrb[28].mxu0 %v511_v27  ;;  %v951_v27 = vld [vmem:[#allocation5 + $0x48] sm:$0xff] }
 0x22c   :  { %v512_v34 = vmax.f32 %v490_v32, 0.0 }
 0x22e   :  { %1760 = vmatprep.mubr.f32.mxu0 %v512_v34 }
 0x22f   :  { %1761 = vmatmul.mubr.f32.gmra.mrb[30].mxu0 %v513_v33 }
 0x2e6   :  { %v1741_v38 = vpop.f32.mrb[16].mxu0 }
 0x2e7   :  { %v2241_v39 = vadd.f32 %v1741_v38, %v2237_v37  ;;  %v603_v40 = vpop.f32.mrb[17].mxu0 }
 0x2e8   :  { %v2244_v42 = vadd.f32 %v2237_v37, %v603_v40 }
 0x2e9   :  { %v2249_v43 = vsel %vm684_vm1, %v2241_v39, -1e+30 }
 0x2ea   :  { %v1744_v44 = vpop.f32.mrb[18].mxu0  ;;  %v2252_v45 = vadd.f32 %v943_v41, %v2249_v43  ;;  %v2257_v46 = vsel %vm684_vm1, %v2244_v42, -1e+30 }
 0x2eb   :  { %v2260_v47 = vadd.f32 %v1744_v44, %v2237_v37  ;;  %v613_v48 = vpop.f32.mrb[19].mxu0  ;;  %v2275_v55 = vadd.f32 %v942_v50, %v2257_v46  ;;  %v953_v44 = vld [vmem:[#allocation5 + $0x58] sm:$0xff] }
 0x2ec   :  { %v2263_v51 = vadd.f32 %v2237_v37, %v613_v48  ;;  %976 = vmax.xlane.f32.xlu0 %v2252_v45 }
 0x2ed   :  { %v2269_v52 = vsel %vm684_vm1, %v2260_v47, -1e+30 }
 0x2ee   :  { %v1747_v53 = vpop.f32.mrb[20].mxu0  ;;  %v2272_v54 = vadd.f32 %v945_v49, %v2269_v52  ;;  %v2280_v56 = vsel %vm684_vm1, %v2263_v51, -1e+30  ;;  %v954_v49 = vld [vmem:[#allocation5 + $0x60] sm:$0xff] }
 0x2ef   :  { %v2283_v57 = vadd.f32 %v1747_v53, %v2237_v37  ;;  %v623_v58 = vpop.f32.mrb[21].mxu0  ;;  %v2296_v0 = vadd.f32 %v944_v59, %v2280_v56 }
 0x2f0   :  { %v2286_v60 = vadd.f32 %v2237_v37, %v623_v58  ;;  %980 = vmax.xlane.f32.xlu1 %v2272_v54  ;;  %974 = vmax.xlane.f32.xlu0 %v2275_v55 }
 0x2f1   :  { %v2301_v1 = vsel %vm684_vm1, %v2283_v57, -1e+30 }
 0x2f2   :  { %v2293_v62 = vsel %vm684_vm1, %v2286_v60, -1e+30  ;;  %v1750_v63 = vpop.f32.mrb[22].mxu0  ;;  %v2320_v10 = vadd.f32 %v947_v5, %v2301_v1 }
 0x2f3   :  { %v2304_v2 = vadd.f32 %v1750_v63, %v2237_v37  ;;  %v633_v3 = vpop.f32.mrb[23].mxu0  ;;  %v2307_v4 = vadd.f32 %v946_v61, %v2293_v62 }
 0x2f4   :  { %v2310_v6 = vadd.f32 %v2237_v37, %v633_v3  ;;  %978 = vmax.xlane.f32.xlu1 %v2296_v0 }
 0x2f5   :  { %982 = vmax.xlane.f32.xlu0 %v2307_v4  ;;  %v2325_v11 = vsel %vm684_vm1, %v2304_v2, -1e+30 }
 0x2f6   :  { %v2317_v8 = vsel %vm684_vm1, %v2310_v6, -1e+30  ;;  %v1753_v9 = vpop.f32.mrb[24].mxu0  ;;  %v2344_v21 = vadd.f32 %v949_v15, %v2325_v11 }
 0x2f7   :  { %v649_v12 = vadd.f32 %v1753_v9, %v2237_v37  ;;  %v643_v13 = vpop.f32.mrb[25].mxu0  ;;  %v2329_v14 = vadd.f32 %v948_v7, %v2317_v8  ;;  %v955_v9 = vld [vmem:[#allocation5 + $0x68] sm:$0xff] }
 0x2f8   :  { %v644_v16 = vadd.f32 %v2237_v37, %v643_v13  ;;  %984 = vmax.xlane.f32.xlu1 %v2320_v10  ;;  %v956_v13 = vld [vmem:[#allocation5 + $0x70] sm:$0xff] }
 0x2f9   :  { %986 = vmax.xlane.f32.xlu0 %v2329_v14  ;;  %v2337_v18 = vsel %vm701_vm2, %v649_v12, 0.0  ;;  %v2352_v23 = vsel %vm684_vm1, %v649_v12, -1e+30 }
 0x2fa   :  { %3381 = vst [vmem:[#allocation16_spill] sm:$0xff] %v2337_v18  ;;  %v2341_v19 = vsel %vm684_vm1, %v644_v16, -1e+30  ;;  %v1756_v20 = vpop.f32.mrb[26].mxu0  ;;  %v2348_v22 = vsel %vm701_vm2, %v644_v16, 0.0  ;;  %v2370_v33 = vadd.f32 %v951_v27, %v2352_v23 }
 0x2fb   :  { %3382 = vst [vmem:[#allocation17_spill] sm:$0xff] %v2348_v22  ;;  %v659_v24 = vadd.f32 %v1756_v20, %v2237_v37  ;;  %v653_v25 = vpop.f32.mrb[27].mxu0  ;;  %v2356_v26 = vadd.f32 %v950_v17, %v2341_v19 }
 0x2fc   :  { %v654_v28 = vadd.f32 %v2237_v37, %v653_v25  ;;  %988 = vmax.xlane.f32.xlu1 %v2344_v21  ;;  %v957_v25 = vld [vmem:[#allocation5 + $0x78] sm:$0xff] }
 0x2fd   :  { %990 = vmax.xlane.f32.xlu0 %v2356_v26  ;;  %v2363_v30 = vsel %vm701_vm2, %v659_v24, 0.0  ;;  %v2378_v35 = vsel %vm684_vm1, %v659_v24, -1e+30 }
 0x2fe   :  { %3383 = vst [vmem:[#allocation18_spill] sm:$0xff] %v2363_v30  ;;  %v2367_v31 = vsel %vm684_vm1, %v654_v28, -1e+30  ;;  %v1759_v32 = vpop.f32.mrb[28].mxu0  ;;  %v2374_v34 = vsel %vm701_vm2, %v654_v28, 0.0  ;;  %v2396_v59 = vadd.f32 %v953_v44, %v2378_v35 }
 0x2ff   :  { %3384 = vst [vmem:[#allocation19_spill] sm:$0xff] %v2374_v34  ;;  %v669_v38 = vadd.f32 %v1759_v32, %v2237_v37  ;;  %v663_v40 = vpop.f32.mrb[29].mxu0  ;;  %v2382_v41 = vadd.f32 %v952_v29, %v2367_v31 }
 0x300   :  { %v664_v48 = vadd.f32 %v2237_v37, %v663_v40  ;;  %992 = vmax.xlane.f32.xlu1 %v2370_v33 }
 0x301   :  { %994 = vmax.xlane.f32.xlu0 %v2382_v41  ;;  %v2389_v50 = vsel %vm701_vm2, %v669_v38, 0.0  ;;  %v2404_v63 = vsel %vm684_vm1, %v669_v38, -1e+30 }
 0x302   :  { %3385 = vst [vmem:[#allocation20_spill] sm:$0xff] %v2389_v50  ;;  %v2393_v53 = vsel %vm684_vm1, %v664_v48, -1e+30  ;;  %v1762_v58 = vpop.f32.mrb[30].mxu0  ;;  %v2400_v61 = vsel %vm701_vm2, %v664_v48, 0.0  ;;  %v2422_v17 = vadd.f32 %v955_v9, %v2404_v63 }
 0x303   :  { %3386 = vst [vmem:[#allocation21_spill] sm:$0xff] %v2400_v61  ;;  %v679_v3 = vadd.f32 %v1762_v58, %v2237_v37  ;;  %v673_v5 = vpop.f32.mrb[31].mxu0  ;;  %v2408_v7 = vadd.f32 %v954_v49, %v2393_v53 }
 0x304   :  { %v674_v12 = vadd.f32 %v2237_v37, %v673_v5  ;;  %996 = vmax.xlane.f32.xlu1 %v2396_v59 }
 0x305   :  { %998 = vmax.xlane.f32.xlu0 %v2408_v7  ;;  %v2415_v15 = vsel %vm701_vm2, %v679_v3, 0.0  ;;  %v2430_v37 = vsel %vm684_vm1, %v679_v3, -1e+30 }
 0x306   :  { %3387 = vst [vmem:[#allocation22_spill] sm:$0xff] %v2415_v15  ;;  %v2419_v16 = vsel %vm684_vm1, %v674_v12, -1e+30  ;;  %v2426_v20 = vsel %vm701_vm2, %v674_v12, 0.0  ;;  %v2438_v27 = vadd.f32 %v957_v25, %v2430_v37 }
 0x307   :  { %3388 = vst [vmem:[#allocation23_spill] sm:$0xff] %v2426_v20  ;;  %v2433_v24 = vadd.f32 %v956_v13, %v2419_v16 }
 0x308   :  { %1000 = vmax.xlane.f32.xlu1 %v2422_v17 }
 0x309   :  { %1002 = vmax.xlane.f32.xlu0 %v2433_v24 }
 0x30c   :  { %1004 = vmax.xlane.f32.xlu1 %v2438_v27 }
 0x30d   :  { %750 = vmax.xlane.f32.xlu0 %v2257_v46 }
 0x310   :  { %752 = vmax.xlane.f32.xlu1 %v2249_v43 }
 0x311   :  { %754 = vmax.xlane.f32.xlu0 %v2280_v56 }
 0x314   :  { %756 = vmax.xlane.f32.xlu1 %v2269_v52 }
 0x315   :  { %758 = vmax.xlane.f32.xlu0 %v2293_v62 }
 0x318   :  { %760 = vmax.xlane.f32.xlu1 %v2301_v1 }
 0x319   :  { %762 = vmax.xlane.f32.xlu0 %v2317_v8 }
 0x31c   :  { %764 = vmax.xlane.f32.xlu1 %v2325_v11 }
 0x31d   :  { %766 = vmax.xlane.f32.xlu0 %v2341_v19 }
 0x320   :  { %768 = vmax.xlane.f32.xlu1 %v2352_v23 }
 0x321   :  { %770 = vmax.xlane.f32.xlu0 %v2367_v31 }
 0x324   :  { %772 = vmax.xlane.f32.xlu1 %v2378_v35 }
 0x325   :  { %774 = vmax.xlane.f32.xlu0 %v2393_v53 }
 0x328   :  { %776 = vmax.xlane.f32.xlu1 %v2404_v63 }
 0x329   :  { %778 = vmax.xlane.f32.xlu0 %v2419_v16 }
 0x32c   :  { %780 = vmax.xlane.f32.xlu1 %v2430_v37 }
 0x379   :  { %v977_v28 = vpop.xlane.xlu0 %976 }
 0x37a   :  { %vm1007_vm3 = vcmp.ge.f32.partialorder %v2252_v45, %v977_v28 }
 0x37b   :  { %v2459_v29 = vsel %vm1007_vm3, %v2232_v36, 128 }
 0x37c   :  { %v1053_v32 = vshra.s32 %v2459_v29, 16 }
 0x37d   :  { %v981_v38 = vpop.xlane.xlu1 %980  ;;  %v975_v40 = vpop.xlane.xlu0 %974 }
 0x37e   :  { %vm1009_vm4 = vcmp.ge.f32.partialorder %v2272_v54, %v981_v38  ;;  %vm1006_vm5 = vcmp.ge.f32.partialorder %v2275_v55, %v975_v40  ;;  %v2464_v44 = vcvt.s32.f32 %v1053_v32 }
 0x37f   :  { %v2467_v48 = vsel %vm1009_vm4, %v2232_v36, 128  ;;  %v2470_v49 = vsel %vm1006_vm5, %v2232_v36, 128 }
 0x380   :  { %1056 = vmin.xlane.f32.xlu1 %v2464_v44  ;;  %v1081_v45 = vshra.s32 %v2467_v48, 16  ;;  %v1039_v58 = vshra.s32 %v2470_v49, 16 }
 0x381   :  { %v979_v3 = vpop.xlane.xlu1 %978 }
 0x382   :  { %vm1008_vm6 = vcmp.ge.f32.partialorder %v2296_v0, %v979_v3  ;;  %v983_v54 = vpop.xlane.xlu0 %982  ;;  %v2476_v5 = vcvt.s32.f32 %v1081_v45  ;;  %v2478_v55 = vcvt.s32.f32 %v1039_v58 }
 0x383   :  { %v2481_v9 = vsel %vm1008_vm6, %v2232_v36, 128  ;;  %vm1010_vm7 = vcmp.ge.f32.partialorder %v2307_v4, %v983_v54 }
 0x384   :  { %3389 = vst [vmem:[#allocation24_spill] sm:$0xff] %v2478_v55  ;;  %1084 = vmin.xlane.f32.xlu1 %v2476_v5  ;;  %1042 = vmin.xlane.f32.xlu0 %v2478_v55  ;;  %v1067_v12 = vshra.s32 %v2481_v9, 16 }
 0x385   :  { %v985_v13 = vpop.xlane.xlu1 %984 }
 0x386   :  { %v987_v25 = vpop.xlane.xlu0 %986  ;;  %v2486_v28 = vcvt.s32.f32 %v1067_v12  ;;  %vm1011_vm8 = vcmp.ge.f32.partialorder %v2320_v10, %v985_v13 }
 0x387   :  { %vm1012_vm9 = vcmp.ge.f32.partialorder %v2329_v14, %v987_v25 }
 0x388   :  { %3390 = vst [vmem:[#allocation25_spill] sm:$0xff] %v2486_v28  ;;  %1070 = vmin.xlane.f32.xlu0 %v2486_v28 }
 0x389   :  { %v989_v0 = vpop.xlane.xlu1 %988 }
 0x38a   :  { %v991_v32 = vpop.xlane.xlu0 %990  ;;  %vm1013_vm10 = vcmp.ge.f32.partialorder %v2344_v21, %v989_v0 }
 0x38b   :  { %vm1014_vm11 = vcmp.ge.f32.partialorder %v2356_v26, %v991_v32 }
 0x38c   :  { %v2550_v21 = vsel %vm1014_vm11, %v2232_v36, 128 }
 0x38d   :  { %v993_v38 = vpop.xlane.xlu1 %992 }
 0x38e   :  { %v995_v40 = vpop.xlane.xlu0 %994  ;;  %vm1015_vm12 = vcmp.ge.f32.partialorder %v2370_v33, %v993_v38 }
 0x38f   :  { %vm1016_vm13 = vcmp.ge.f32.partialorder %v2382_v41, %v995_v40  ;;  %v2556_v26 = vsel %vm1015_vm12, %v2232_v36, 128 }
 0x390   :  { %v1165_v41 = vshra.s32 %v2556_v26, 16 }
 0x391   :  { %v2489_v45 = vpop.xlane.xlu1 %996 }
 0x392   :  { %v2491_v58 = vpop.xlane.xlu0 %998  ;;  %vm1017_vm14 = vcmp.ge.f32.partialorder %v2396_v59, %v2489_v45 }
 0x393   :  { %vm1018_vm15 = vcmp.ge.f32.partialorder %v2408_v7, %v2491_v58 }
 0x394   :  { %v2588_v45 = vsel %vm1018_vm15, %v2232_v36, 128 }
 0x395   :  { %v2493_v3 = vpop.xlane.xlu1 %1000 }
 0x396   :  { %v2495_v15 = vpop.xlane.xlu0 %1002  ;;  %vm1019_vm1 = vcmp.ge.f32.partialorder %v2422_v17, %v2493_v3 }
 0x397   :  { %vm1020_vm3 = vcmp.ge.f32.partialorder %v2433_v24, %v2495_v15  ;;  %v2600_v17 = vsel %vm1019_vm1, %v2232_v36, 128 }
 0x398   :  { %v2611_v15 = vsel %vm1020_vm3, %v2232_v36, 128 }
 0x399   :  { %v2497_v50 = vpop.xlane.xlu1 %1004 }
 0x39a   :  { %v751_v30 = vpop.xlane.xlu0 %750  ;;  %vm1021_vm4 = vcmp.ge.f32.partialorder %v2438_v27, %v2497_v50 }
 0x39b   :  { %v2500_v12 = vsub.f32 %v2257_v46, %v751_v30  ;;  %v2629_v50 = vsel %vm1021_vm4, %v2232_v36, 128 }
 0x39d   :  { %3391 = vst [vmem:[#allocation26_spill] sm:$0xff] %v2500_v12  ;;  %v798_v20 = vmul.f32 1.442695, %v2500_v12  ;;  %v753_v61 = vpop.xlane.xlu1 %752  ;;  %v2516_v12 = vsel %vm1010_vm7, %v2232_v36, 128 }
 0x39e   :  { %v2504_v34 = vsub.f32 %v2249_v43, %v753_v61  ;;  %v755_v18 = vpop.xlane.xlu0 %754 }
 0x39f   :  { %1835 = vpow2.f32 %v798_v20  ;;  %v2507_v22 = vsub.f32 %v2280_v56, %v755_v18  ;;  %v2521_v56 = vsel %vm1011_vm8, %v2232_v36, 128  ;;  %v1095_v18 = vshra.s32 %v2516_v12, 16 }
 0x3a0   :  { %v800_v28 = vmul.f32 1.442695, %v2504_v34  ;;  %v2534_v20 = vsel %vm1012_vm9, %v2232_v36, 128 }
 0x3a1   :  { %3392 = vst [vmem:[#allocation27_spill] sm:$0xff] %v2507_v22  ;;  %v757_v55 = vpop.xlane.xlu1 %756  ;;  %v802_v30 = vmul.f32 1.442695, %v2507_v22  ;;  %v2531_v10 = vcvt.s32.f32 %v1095_v18  ;;  %v1123_v13 = vshra.s32 %v2534_v20, 16 }
 0x3a2   :  { %1837 = vpow2.f32 %v800_v28  ;;  %v2512_v46 = vsub.f32 %v2269_v52, %v757_v55  ;;  %v1109_v52 = vshra.s32 %v2521_v56, 16  ;;  %v759_v54 = vpop.xlane.xlu0 %758  ;;  %v2543_v55 = vsel %vm1013_vm10, %v2232_v36, 128 }
 0x3a3   :  { %1839 = vpow2.f32 %v802_v30  ;;  %v1137_v0 = vshra.s32 %v2543_v55, 16  ;;  %v2561_v38 = vcvt.s32.f32 %v1123_v13  ;;  %v1151_v30 = vshra.s32 %v2550_v21, 16 }
 0x3a4   :  { %3393 = vst [vmem:[#allocation28_spill] sm:$0xff] %v2512_v46  ;;  %v804_v43 = vmul.f32 1.442695, %v2512_v46  ;;  %v2540_v14 = vcvt.s32.f32 %v1109_v52  ;;  %v2575_v40 = vsub.f32 %v2293_v62, %v759_v54  ;;  %v2580_v13 = vsel %vm1017_vm14, %v2232_v36, 128 }
 0x3a5   :  { %v761_v28 = vpop.xlane.xlu1 %760  ;;  %v2577_v52 = vcvt.s32.f32 %v1137_v0  ;;  %v2584_v59 = vcvt.s32.f32 %v1151_v30  ;;  %v2597_v54 = vcvt.s32.f32 %v1165_v41  ;;  %v1193_v30 = vshra.s32 %v2580_v13, 16 }
 0x3a6   :  { %1841 = vpow2.f32 %v804_v43  ;;  %v763_v32 = vpop.xlane.xlu0 %762  ;;  %v2565_v43 = vsel %vm1016_vm13, %v2232_v36, 128  ;;  %3394 = vst [vmem:[#allocation29_spill] sm:$0xff] %v2575_v40  ;;  %v2594_v62 = vsub.f32 %v2301_v1, %v761_v28  ;;  %v806_v3 = vmul.f32 1.442695, %v2575_v40 }
 0x3a7   :  { %v1179_v7 = vshra.s32 %v2565_v43, 16  ;;  %v2604_v0 = vsub.f32 %v2317_v8, %v763_v32  ;;  %v1207_v1 = vshra.s32 %v2588_v45, 16  ;;  %v1221_v32 = vshra.s32 %v2600_v17, 16 }
 0x3a8   :  { %3395 = vst [vmem:[#allocation30_spill] sm:$0xff] %v2594_v62  ;;  %v808_v28 = vmul.f32 1.442695, %v2594_v62  ;;  %1843 = vpow2.f32 %v806_v3  ;;  %v2626_v40 = vcvt.s32.f32 %v1193_v30 }
 0x3a9   :  { %v2524_v4 = vpop.eup %1835  ;;  %v765_v18 = vpop.xlane.xlu1 %764  ;;  %3396 = vst [vmem:[#allocation31_spill] sm:$0xff] %v2604_v0  ;;  %v2607_v46 = vcvt.s32.f32 %v1179_v7  ;;  %v810_v41 = vmul.f32 1.442695, %v2604_v0  ;;  %v2631_v62 = vcvt.s32.f32 %v1207_v1  ;;  %v1249_v0 = vshra.s32 %v2629_v50, 16 }
 0x3aa   :  { %830 = vadd.xlane.f32.xlu0 %v2524_v4  ;;  %v767_v58 = vpop.xlane.xlu0 %766  ;;  %v2618_v8 = vsub.f32 %v2325_v11, %v765_v18  ;;  %v1235_v11 = vshra.s32 %v2611_v15, 16  ;;  %1845 = vpow2.f32 %v808_v28 }
 0x3ab   :  { %v2624_v7 = vsub.f32 %v2341_v19, %v767_v58  ;;  %v2640_v19 = vcvt.s32.f32 %v1221_v32  ;;  %1847 = vpow2.f32 %v810_v41 }
 0x3ac   :  { %v2529_v61 = vpop.eup %1837  ;;  %3397 = vst [vmem:[#allocation32_spill] sm:$0xff] %v2618_v8  ;;  %v812_v18 = vmul.f32 1.442695, %v2618_v8  ;;  %v2647_v22 = vcvt.s32.f32 %v1235_v11 }
 0x3ad   :  { %832 = vadd.xlane.f32.xlu1 %v2529_v61  ;;  %v2547_v25 = vpop.eup %1839  ;;  %v769_v24 = vpop.xlane.xlu1 %768  ;;  %v814_v58 = vmul.f32 1.442695, %v2624_v7 }
 0x3ae   :  { %1098 = vmin.xlane.f32.xlu0 %v2531_v10  ;;  %v771_v27 = vpop.xlane.xlu0 %770  ;;  %v2637_v3 = vsub.f32 %v2352_v23, %v769_v24  ;;  %1849 = vpow2.f32 %v812_v18 }
 0x3af   :  { %v2644_v30 = vsub.f32 %v2367_v31, %v771_v27  ;;  %1851 = vpow2.f32 %v814_v58  ;;  %v2656_v31 = vcvt.s32.f32 %v1249_v0 }
 0x3b0   :  { %v2559_v33 = vpop.eup %1841  ;;  %3398 = vst [vmem:[#allocation33_spill] sm:$0xff] %v2637_v3  ;;  %v816_v23 = vmul.f32 1.442695, %v2637_v3  ;;  %v702_v3 = vsel %vm701_vm2, %v2244_v42, 0.0 }
 0x3b1   :  { %1112 = vmin.xlane.f32.xlu1 %v2540_v14  ;;  %3399 = vst [vmem:[#allocation34_spill] sm:$0xff] %v2644_v30  ;;  %v773_v1 = vpop.xlane.xlu1 %772  ;;  %v818_v28 = vmul.f32 1.442695, %v2644_v30 }
 0x3b2   :  { %834 = vadd.xlane.f32.xlu0 %v2547_v25  ;;  %v2652_v24 = vsub.f32 %v2378_v35, %v773_v1  ;;  %v2658_v32 = vpop.eup %1843  ;;  %1853 = vpow2.f32 %v816_v23  ;;  %v775_v18 = vpop.xlane.xlu0 %774 }
 0x3b3   :  { %1855 = vpow2.f32 %v818_v28  ;;  %v2682_v28 = vsub.f32 %v2393_v53, %v775_v18  ;;  %v703_v18 = vsel %vm701_vm2, %v2241_v39, 0.0  ;;  %v706_v39 = vsel %vm701_vm2, %v2286_v60, 0.0 }
 0x3b4   :  { %3400 = vst [vmem:[#allocation35_spill] sm:$0xff] %v2652_v24  ;;  %v820_v41 = vmul.f32 1.442695, %v2652_v24  ;;  %v2663_v27 = vpop.eup %1845 }
 0x3b5   :  { %836 = vadd.xlane.f32.xlu1 %v2559_v33  ;;  %v2665_v35 = vpop.eup %1847  ;;  %v777_v23 = vpop.xlane.xlu1 %776 }
 0x3b6   :  { %1126 = vmin.xlane.f32.xlu0 %v2561_v38  ;;  %1857 = vpow2.f32 %v820_v41  ;;  %v779_v24 = vpop.xlane.xlu0 %778  ;;  %v2691_v30 = vsub.f32 %v2404_v63, %v777_v23 }
 0x3b7   :  { %v2695_v8 = vsub.f32 %v2419_v16, %v779_v24  ;;  %v708_v24 = vsel %vm701_vm2, %v2310_v6, 0.0  ;;  %v1052_v6 = vand.u32 65535, %v2459_v29  ;;  %v1066_v29 = vand.u32 65535, %v2481_v9 }
 0x3b8   :  { %v2669_v0 = vpop.eup %1849  ;;  %v824_v42 = vmul.f32 1.442695, %v2691_v30  ;;  %v1094_v9 = vand.u32 65535, %v2516_v12  ;;  %v1122_v12 = vand.u32 65535, %v2534_v20  ;;  %v1164_v20 = vand.u32 65535, %v2556_v26 }
 0x3b9   :  { %1140 = vmin.xlane.f32.xlu1 %v2577_v52  ;;  %v2671_v11 = vpop.eup %1851  ;;  %v781_v53 = vpop.xlane.xlu1 %780  ;;  %v826_v16 = vmul.f32 1.442695, %v2695_v8  ;;  %v1192_v26 = vand.u32 65535, %v2580_v13 }
 0x3ba   :  { %1154 = vmin.xlane.f32.xlu0 %v2584_v59  ;;  %v2705_v63 = vsub.f32 %v2430_v37, %v781_v53  ;;  %v707_v37 = vsel %vm701_vm2, %v2283_v57, 0.0  ;;  %v1080_v53 = vand.u32 65535, %v2467_v48  ;;  %v3403_v48 = vld [vmem:[#allocation24_spill] sm:$0xff] }
 0x3bb   :  { %v1194_v13 = vcvt.s32.f32 %v1192_v26 }
 0x3bc   :  { %v2675_v58 = vpop.eup %1853 }
 0x3bd   :  { %1168 = vmin.xlane.f32.xlu1 %v2597_v54  ;;  %3401 = vst [vmem:[#allocation36_spill] sm:$0xff] %v2675_v58  ;;  %v2677_v1 = vpop.eup %1855 }
 0x3be   :  { %1182 = vmin.xlane.f32.xlu0 %v2607_v46 }
 0x3c0   :  { %v2684_v41 = vpop.eup %1857 }
 0x3c1   :  { %1196 = vmin.xlane.f32.xlu1 %v2626_v40  ;;  %3402 = vst [vmem:[#allocation37_spill] sm:$0xff] %v2684_v41 }
 0x3c2   :  { %1210 = vmin.xlane.f32.xlu0 %v2631_v62 }
 0x3c5   :  { %1224 = vmin.xlane.f32.xlu1 %v2640_v19 }
 0x3c6   :  { %1238 = vmin.xlane.f32.xlu0 %v2647_v22 }
 0x3c9   :  { %1252 = vmin.xlane.f32.xlu1 %v2656_v31 }
 0x3ca   :  { %838 = vadd.xlane.f32.xlu0 %v2658_v32 }
 0x3cd   :  { %840 = vadd.xlane.f32.xlu1 %v2663_v27 }
 0x3ce   :  { %842 = vadd.xlane.f32.xlu0 %v2665_v35 }
 0x3d1   :  { %844 = vadd.xlane.f32.xlu1 %v2669_v0 }
 0x3d2   :  { %846 = vadd.xlane.f32.xlu0 %v2671_v11 }
 0x3d5   :  { %848 = vadd.xlane.f32.xlu1 %v2675_v58  ;;  %v822_v58 = vmul.f32 1.442695, %v2682_v28 }
 0x3d6   :  { %850 = vadd.xlane.f32.xlu0 %v2677_v1 }
 0x3d7   :  { %1859 = vpow2.f32 %v822_v58 }
 0x3d8   :  { %1861 = vpow2.f32 %v824_v42 }
 0x3d9   :  { %852 = vadd.xlane.f32.xlu1 %v2684_v41  ;;  %v704_v41 = vsel %vm701_vm2, %v2263_v51, 0.0  ;;  %v828_v51 = vmul.f32 1.442695, %v2705_v63  ;;  %1863 = vpow2.f32 %v826_v16 }
 0x3da   :  { %718 = vadd.xlane.f32.xlu0 %v702_v3  ;;  %v705_v3 = vsel %vm701_vm2, %v2260_v47, 0.0  ;;  %v709_v47 = vsel %vm701_vm2, %v2304_v2, 0.0 }
 0x3db   :  { %1865 = vpow2.f32 %v828_v51 }
 0x3dd   :  { %720 = vadd.xlane.f32.xlu1 %v703_v18  ;;  %v1038_v18 = vand.u32 65535, %v2470_v49 }
 0x3de   :  { %722 = vadd.xlane.f32.xlu0 %v704_v41  ;;  %v1054_v41 = vcvt.s32.f32 %v1052_v6 }
 0x3df   :  { %v1040_v51 = vcvt.s32.f32 %v1038_v18 }
 0x3e1   :  { %724 = vadd.xlane.f32.xlu1 %v705_v3  ;;  %v2724_v60 = vpop.eup %1859 }
 0x3e2   :  { %726 = vadd.xlane.f32.xlu0 %v706_v39  ;;  %v2727_v58 = vpop.eup %1861  ;;  %v1082_v39 = vcvt.s32.f32 %v1080_v53  ;;  %v1108_v53 = vand.u32 65535, %v2521_v56 }
 0x3e3   :  { %v2729_v23 = vpop.eup %1863 }
 0x3e5   :  { %728 = vadd.xlane.f32.xlu1 %v707_v37  ;;  %v2733_v57 = vpop.eup %1865 }
 0x3e6   :  { %730 = vadd.xlane.f32.xlu0 %v708_v24  ;;  %v1068_v24 = vcvt.s32.f32 %v1066_v29  ;;  %v1110_v29 = vcvt.s32.f32 %v1108_v53 }
 0x3e9   :  { %732 = vadd.xlane.f32.xlu1 %v709_v47  ;;  %v3404_v47 = vld [vmem:[#allocation25_spill] sm:$0xff] }
 0x3ea   :  { %854 = vadd.xlane.f32.xlu0 %v2724_v60 }
 0x3ed   :  { %856 = vadd.xlane.f32.xlu1 %v2727_v58 }
 0x3ee   :  { %858 = vadd.xlane.f32.xlu0 %v2729_v23 }
 0x3f1   :  { %860 = vadd.xlane.f32.xlu1 %v2733_v57 }
 0x40d   :  { %v2737_v2 = vpop.xlane.xlu1 %1056 }
 0x40e   :  { %vm1058_vm2 = vcmp.eq.f32.partialorder %v2464_v44, %v2737_v2 }
 0x40f   :  { %v1059_v42 = vsel %vm1058_vm2, %v1054_v41, inf }
 0x410   :  { %1060 = vmin.xlane.f32.xlu1 %v1059_v42  ;;  %v1096_v42 = vcvt.s32.f32 %v1094_v9 }
 0x411   :  { %v2743_v16 = vpop.xlane.xlu1 %1084  ;;  %v2745_v3 = vpop.xlane.xlu0 %1042 }
 0x412   :  { %vm1086_vm5 = vcmp.eq.f32.partialorder %v2476_v5, %v2743_v16  ;;  %vm1044_vm6 = vcmp.eq.f32.partialorder %v3403_v48, %v2745_v3 }
 0x413   :  { %v1087_v49 = vsel %vm1086_vm5, %v1082_v39, inf  ;;  %v1045_v37 = vsel %vm1044_vm6, %v1040_v51, inf }
 0x414   :  { %1088 = vmin.xlane.f32.xlu1 %v1087_v49  ;;  %1046 = vmin.xlane.f32.xlu0 %v1045_v37  ;;  %v1136_v37 = vand.u32 65535, %v2543_v55 }
 0x415   :  { %v2752_v44 = vpop.xlane.xlu0 %1070 }
 0x416   :  { %vm1072_vm7 = vcmp.eq.f32.partialorder %v3404_v47, %v2752_v44  ;;  %v1150_v47 = vand.u32 65535, %v2550_v21 }
 0x417   :  { %v1073_v6 = vsel %vm1072_vm7, %v1068_v24, inf }
 0x418   :  { %1074 = vmin.xlane.f32.xlu0 %v1073_v6  ;;  %v1152_v55 = vcvt.s32.f32 %v1150_v47 }
 0x437   :  { %v2756_v41 = vpop.xlane.xlu0 %830 }
 0x438   :  { %1867 = vrcp.f32 %v2756_v41 }
 0x43a   :  { %v2759_v5 = vpop.xlane.xlu1 %832 }
 0x43b   :  { %v2762_v18 = vpop.xlane.xlu0 %1098  ;;  %1869 = vrcp.f32 %v2759_v5 }
 0x43c   :  { %vm1100_vm8 = vcmp.eq.f32.partialorder %v2531_v10, %v2762_v18  ;;  %v1124_v10 = vcvt.s32.f32 %v1122_v12 }
 0x43d   :  { %v1101_v39 = vsel %vm1100_vm8, %v1096_v42, inf  ;;  %v1178_v42 = vand.u32 65535, %v2565_v43 }
 0x43e   :  { %v2766_v51 = vpop.xlane.xlu1 %1112  ;;  %1102 = vmin.xlane.f32.xlu0 %v1101_v39 }
 0x43f   :  { %v2768_v48 = vpop.xlane.xlu0 %834  ;;  %vm1114_vm9 = vcmp.eq.f32.partialorder %v2540_v14, %v2766_v51  ;;  %v1138_v14 = vcvt.s32.f32 %v1136_v37  ;;  %v1180_v43 = vcvt.s32.f32 %v1178_v42 }
 0x440   :  { %v1115_v49 = vsel %vm1114_vm9, %v1110_v29, inf  ;;  %v1166_v29 = vcvt.s32.f32 %v1164_v20  ;;  %1871 = vrcp.f32 %v2768_v48  ;;  %v1248_v20 = vand.u32 65535, %v2629_v50 }
 0x441   :  { %1116 = vmin.xlane.f32.xlu1 %v1115_v49 }
 0x442   :  { %v2773_v56 = vpop.xlane.xlu1 %836 }
 0x443   :  { %v2776_v24 = vpop.xlane.xlu0 %1126  ;;  %1873 = vrcp.f32 %v2773_v56 }
 0x444   :  { %vm1128_vm10 = vcmp.eq.f32.partialorder %v2561_v38, %v2776_v24 }
 0x445   :  { %v1129_v6 = vsel %vm1128_vm10, %v1124_v10, inf  ;;  %v1220_v10 = vand.u32 65535, %v2600_v17 }
 0x446   :  { %v2781_v9 = vpop.xlane.xlu1 %1140  ;;  %1130 = vmin.xlane.f32.xlu0 %v1129_v6 }
 0x447   :  { %v2784_v53 = vpop.xlane.xlu0 %1154  ;;  %vm1142_vm11 = vcmp.eq.f32.partialorder %v2577_v52, %v2781_v9  ;;  %v1206_v52 = vand.u32 65535, %v2588_v45  ;;  %v1222_v17 = vcvt.s32.f32 %v1220_v10  ;;  %v3406_v10 = vld [vmem:[#allocation26_spill] sm:$0xff] }
 0x448   :  { %v1143_v39 = vsel %vm1142_vm11, %v1138_v14, inf  ;;  %vm1156_vm12 = vcmp.eq.f32.partialorder %v2584_v59, %v2784_v53 }
 0x449   :  { %1144 = vmin.xlane.f32.xlu1 %v1143_v39  ;;  %v1157_v21 = vsel %vm1156_vm12, %v1152_v55, inf  ;;  %v1208_v45 = vcvt.s32.f32 %v1206_v52 }
 0x44a   :  { %v2791_v38 = vpop.xlane.xlu1 %1168  ;;  %1158 = vmin.xlane.f32.xlu0 %v1157_v21  ;;  %v1250_v21 = vcvt.s32.f32 %v1248_v20 }
 0x44b   :  { %v2795_v12 = vpop.xlane.xlu0 %1182  ;;  %vm1170_vm13 = vcmp.eq.f32.partialorder %v2597_v54, %v2791_v38 }
 0x44c   :  { %v1171_v49 = vsel %vm1170_vm13, %v1166_v29, inf  ;;  %vm1184_vm14 = vcmp.eq.f32.partialorder %v2607_v46, %v2795_v12  ;;  %v1234_v46 = vand.u32 65535, %v2611_v15 }
 0x44d   :  { %1172 = vmin.xlane.f32.xlu1 %v1171_v49  ;;  %v1185_v59 = vsel %vm1184_vm14, %v1180_v43, inf }
 0x44e   :  { %v2803_v37 = vpop.xlane.xlu1 %1196  ;;  %1186 = vmin.xlane.f32.xlu0 %v1185_v59 }
 0x44f   :  { %v2807_v54 = vpop.xlane.xlu0 %1210  ;;  %vm1198_vm15 = vcmp.eq.f32.partialorder %v2626_v40, %v2803_v37  ;;  %v1236_v40 = vcvt.s32.f32 %v1234_v46  ;;  %v3407_v46 = vld [vmem:[#allocation16_spill] sm:$0xff] }
 0x450   :  { %v1199_v47 = vsel %vm1198_vm15, %v1194_v13, inf  ;;  %vm1212_vm1 = vcmp.eq.f32.partialorder %v2631_v62, %v2807_v54  ;;  %v1868_v62 = vpop.eup %1867 }
 0x451   :  { %1200 = vmin.xlane.f32.xlu1 %v1199_v47  ;;  %v1213_v6 = vsel %vm1212_vm1, %v1208_v45, inf  ;;  %v1870_v50 = vpop.eup %1869 }
 0x452   :  { %v2815_v14 = vpop.xlane.xlu1 %1224  ;;  %1214 = vmin.xlane.f32.xlu0 %v1213_v6  ;;  %v1872_v43 = vpop.eup %1871  ;;  %v927_v59 = vmul.f32 %v1870_v50, %v2529_v61  ;;  %v3413_v50 = vld [vmem:[#allocation19_spill] sm:$0xff] }
 0x453   :  { %v2818_v55 = vpop.xlane.xlu0 %1238  ;;  %vm1226_vm3 = vcmp.eq.f32.partialorder %v2640_v19, %v2815_v14  ;;  %v926_v19 = vmul.f32 %v1868_v62, %v2524_v4  ;;  %v1874_v13 = vpop.eup %1873 }
 0x454   :  { %v1227_v15 = vsel %vm1226_vm3, %v1222_v17, inf  ;;  %vm1240_vm4 = vcmp.eq.f32.partialorder %v2647_v22, %v2818_v55  ;;  %v3405_v22 = vld [vmem:[#allocation17_spill] sm:$0xff]  ;;  %v1343_v6 = vmul.f32 %v927_v59, %v2504_v34  ;;  %v929_v61 = vmul.f32 %v1874_v13, %v2559_v33  ;;  %v3408_v17 = vld [vmem:[#allocation27_spill] sm:$0xff] }
 0x455   :  { %1228 = vmin.xlane.f32.xlu1 %v1227_v15  ;;  %v1241_v42 = vsel %vm1240_vm4, %v1236_v40, inf  ;;  %v1342_v45 = vmul.f32 %v926_v19, %v3406_v10  ;;  %v3411_v15 = vld [vmem:[#allocation28_spill] sm:$0xff]  ;;  %v3415_v13 = vld [vmem:[#allocation21_spill] sm:$0xff] }
 0x456   :  { %v2824_v39 = vpop.xlane.xlu1 %1252  ;;  %1242 = vmin.xlane.f32.xlu0 %v1241_v42  ;;  %v1345_v62 = vmul.f32 %v929_v61, %v3411_v15  ;;  %v3417_v61 = vld [vmem:[#allocation18_spill] sm:$0xff] }
 0x457   :  { %v2826_v29 = vpop.xlane.xlu0 %838  ;;  %vm1254_vm2 = vcmp.eq.f32.partialorder %v2656_v31, %v2824_v39  ;;  %v928_v31 = vmul.f32 %v1872_v43, %v2547_v25  ;;  %v3414_v43 = vld [vmem:[#allocation30_spill] sm:$0xff] }
 0x458   :  { %v1255_v26 = vsel %vm1254_vm2, %v1250_v21, inf }
 0x459   :  { %1256 = vmin.xlane.f32.xlu1 %v1255_v26  ;;  %v1344_v20 = vmul.f32 %v928_v31, %v3408_v17 }
 0x45a   :  { %v2831_v52 = vpop.xlane.xlu1 %840  ;;  %734 = vadd.xlane.f32.xlu0 %v3405_v22 }
 0x45b   :  { %v2834_v49 = vpop.xlane.xlu0 %842  ;;  %1875 = vrcp.f32 %v2831_v52 }
 0x45c   :  { %1877 = vrcp.f32 %v2826_v29 }
 0x45d   :  { %736 = vadd.xlane.f32.xlu1 %v3407_v46  ;;  %1879 = vrcp.f32 %v2834_v49 }
 0x45e   :  { %v2841_v4 = vpop.xlane.xlu1 %844  ;;  %1358 = vadd.xlane.f32.xlu0 %v1342_v45 }
 0x45f   :  { %v2844_v47 = vpop.xlane.xlu0 %846 }
 0x460   :  { %1881 = vrcp.f32 %v2844_v47 }
 0x461   :  { %1360 = vadd.xlane.f32.xlu1 %v1343_v6  ;;  %1883 = vrcp.f32 %v2841_v4  ;;  %v3416_v6 = vld [vmem:[#allocation23_spill] sm:$0xff] }
 0x462   :  { %v2849_v40 = vpop.xlane.xlu1 %848  ;;  %1362 = vadd.xlane.f32.xlu0 %v1344_v20 }
 0x463   :  { %3409 = vst [vmem:[#allocation24_spill] sm:$0xff] %v2849_v40  ;;  %v2852_v25 = vpop.xlane.xlu0 %850 }
 0x464   :  { %3410 = vst [vmem:[#allocation25_spill] sm:$0xff] %v2852_v25  ;;  %1885 = vrcp.f32 %v2852_v25 }
 0x465   :  { %1364 = vadd.xlane.f32.xlu1 %v1345_v62  ;;  %v1876_v42 = vpop.eup %1875  ;;  %1887 = vrcp.f32 %v2849_v40  ;;  %v3419_v62 = vld [vmem:[#allocation29_spill] sm:$0xff] }
 0x466   :  { %v2855_v21 = vpop.xlane.xlu1 %852  ;;  %738 = vadd.xlane.f32.xlu0 %v3413_v50  ;;  %v931_v26 = vmul.f32 %v1876_v42, %v2663_v27  ;;  %v1878_v19 = vpop.eup %1877 }
 0x467   :  { %3412 = vst [vmem:[#allocation17_spill] sm:$0xff] %v2855_v21  ;;  %v2859_v33 = vpop.xlane.xlu0 %718  ;;  %v930_v31 = vmul.f32 %v1878_v19, %v2658_v32  ;;  %v1880_v46 = vpop.eup %1879  ;;  %1889 = vrcp.f32 %v2855_v21  ;;  %v3421_v32 = vld [vmem:[#allocation20_spill] sm:$0xff] }
 0x468   :  { %v1347_v22 = vmul.f32 %v931_v26, %v3414_v43  ;;  %v932_v50 = vmul.f32 %v1880_v46, %v2665_v35  ;;  %v3425_v35 = vld [vmem:[#allocation22_spill] sm:$0xff] }
 0x469   :  { %v1346_v42 = vmul.f32 %v930_v31, %v3419_v62 }
 0x46a   :  { %v2864_v59 = vpop.xlane.xlu1 %720  ;;  %742 = vadd.xlane.f32.xlu0 %v3415_v13  ;;  %1368 = vadd.xlane.f32.xlu1 %v1347_v22  ;;  %v1882_v26 = vpop.eup %1881 }
 0x46b   :  { %v2868_v45 = vpop.xlane.xlu0 %722  ;;  %v1884_v22 = vpop.eup %1883 }
 0x46c   :  { %v933_v21 = vmul.f32 %v1884_v22, %v2669_v0  ;;  %v3429_v22 = vld [vmem:[#allocation34_spill] sm:$0xff] }
 0x46e   :  { %v2872_v27 = vpop.xlane.xlu1 %724  ;;  %746 = vadd.xlane.f32.xlu0 %v3416_v6  ;;  %740 = vadd.xlane.f32.xlu1 %v3417_v61  ;;  %v3423_v6 = vld [vmem:[#allocation31_spill] sm:$0xff]  ;;  %v934_v61 = vmul.f32 %v1882_v26, %v2671_v11  ;;  %v3427_v11 = vld [vmem:[#allocation36_spill] sm:$0xff] }
 0x46f   :  { %v2876_v20 = vpop.xlane.xlu0 %726  ;;  %v1348_v40 = vmul.f32 %v932_v50, %v3423_v6  ;;  %v3426_v50 = vld [vmem:[#allocation32_spill] sm:$0xff] }
 0x470   :  { %3418 = vst [vmem:[#allocation26_spill] sm:$0xff] %v2876_v20  ;;  %v1886_v20 = vpop.eup %1885 }
 0x471   :  { %v1888_v25 = vpop.eup %1887 }
 0x472   :  { %v2881_v13 = vpop.xlane.xlu1 %728  ;;  %1366 = vadd.xlane.f32.xlu0 %v1346_v42  ;;  %744 = vadd.xlane.f32.xlu1 %v3421_v32  ;;  %v1350_v42 = vmul.f32 %v934_v61, %v2624_v7  ;;  %v936_v32 = vmul.f32 %v1886_v20, %v2677_v1  ;;  %v935_v26 = vmul.f32 %v1888_v25, %v3427_v11  ;;  %v3430_v61 = vld [vmem:[#allocation33_spill] sm:$0xff]  ;;  %v3433_v25 = vld [vmem:[#allocation35_spill] sm:$0xff] }
 0x473   :  { %3420 = vst [vmem:[#allocation16_spill] sm:$0xff] %v2881_v13  ;;  %v2884_v19 = vpop.xlane.xlu0 %730  ;;  %v1890_v13 = vpop.eup %1889  ;;  %v3431_v1 = vld [vmem:[#allocation37_spill] sm:$0xff] }
 0x474   :  { %3422 = vst [vmem:[#allocation27_spill] sm:$0xff] %v2884_v19  ;;  %v1349_v19 = vmul.f32 %v933_v21, %v3426_v50  ;;  %v937_v20 = vmul.f32 %v1890_v13, %v3431_v1 }
 0x476   :  { %v2889_v31 = vpop.xlane.xlu1 %732  ;;  %1370 = vadd.xlane.f32.xlu0 %v1348_v40  ;;  %748 = vadd.xlane.f32.xlu1 %v3425_v35  ;;  %v1352_v35 = vmul.f32 %v936_v32, %v3429_v22 }
 0x477   :  { %3424 = vst [vmem:[#allocation28_spill] sm:$0xff] %v2889_v31  ;;  %v2892_v46 = vpop.xlane.xlu0 %854  ;;  %v1351_v31 = vmul.f32 %v935_v26, %v3430_v61 }
 0x478   :  { %1891 = vrcp.f32 %v2892_v46 }
 0x47a   :  { %v2899_v0 = vpop.xlane.xlu1 %856  ;;  %1374 = vadd.xlane.f32.xlu0 %v1350_v42  ;;  %1372 = vadd.xlane.f32.xlu1 %v1349_v19  ;;  %v1353_v19 = vmul.f32 %v937_v20, %v3433_v25 }
 0x47b   :  { %3428 = vst [vmem:[#allocation19_spill] sm:$0xff] %v2899_v0  ;;  %v2901_v40 = vpop.xlane.xlu0 %858  ;;  %1893 = vrcp.f32 %v2899_v0 }
 0x47c   :  { %1895 = vrcp.f32 %v2901_v40 }
 0x47e   :  { %v2908_v21 = vpop.xlane.xlu1 %860  ;;  %1378 = vadd.xlane.f32.xlu0 %v1352_v35  ;;  %1376 = vadd.xlane.f32.xlu1 %v1351_v31 }
 0x47f   :  { %3432 = vst [vmem:[#allocation30_spill] sm:$0xff] %v2908_v21  ;;  %1897 = vrcp.f32 %v2908_v21 }
 0x480   :  { %1899 = vlog2.f32 %v2756_v41  ;;  %v1245_v41 = vcvt.f32.s32 %v2818_v55 }
 0x481   :  { %1901 = vlog2.f32 %v2759_v5 }
 0x482   :  { %v1892_v42 = vpop.eup %1891  ;;  %1380 = vadd.xlane.f32.xlu1 %v1353_v19  ;;  %v1063_v19 = vcvt.f32.s32 %v2737_v2  ;;  %1903 = vlog2.f32 %v2768_v48  ;;  %v1246_v48 = vshll.u32 %v1245_v41, 16 }
 0x483   :  { %v938_v11 = vmul.f32 %v1892_v42, %v2724_v60  ;;  %1905 = vlog2.f32 %v2773_v56 }
 0x484   :  { %1907 = vlog2.f32 %v2831_v52 }
 0x485   :  { %v1894_v0 = vpop.eup %1893  ;;  %v1354_v32 = vmul.f32 %v938_v11, %v2682_v28  ;;  %v1064_v11 = vshll.u32 %v1063_v19, 16  ;;  %1909 = vlog2.f32 %v2826_v29 }
 0x486   :  { %v939_v26 = vmul.f32 %v1894_v0, %v2727_v58  ;;  %v1896_v13 = vpop.eup %1895  ;;  %v1091_v58 = vcvt.f32.s32 %v2743_v16  ;;  %v1049_v0 = vcvt.f32.s32 %v2745_v3  ;;  %1911 = vlog2.f32 %v2834_v49 }
 0x487   :  { %1382 = vadd.xlane.f32.xlu0 %v1354_v32  ;;  %v940_v35 = vmul.f32 %v1896_v13, %v2729_v23  ;;  %1913 = vlog2.f32 %v2844_v47 }
 0x488   :  { %v1355_v1 = vmul.f32 %v939_v26, %v2691_v30  ;;  %v1092_v26 = vshll.u32 %v1091_v58, 16  ;;  %v1050_v13 = vshll.u32 %v1049_v0, 16  ;;  %1915 = vlog2.f32 %v2841_v4 }
 0x489   :  { %v1898_v31 = vpop.eup %1897  ;;  %v1356_v21 = vmul.f32 %v940_v35, %v2695_v8 }
 0x48a   :  { %1384 = vadd.xlane.f32.xlu1 %v1355_v1  ;;  %v941_v20 = vmul.f32 %v1898_v31, %v2733_v57  ;;  %v1077_v57 = vcvt.f32.s32 %v2752_v44 }
 0x48b   :  { %1386 = vadd.xlane.f32.xlu0 %v1356_v21 }
 0x48c   :  { %v1357_v60 = vmul.f32 %v941_v20, %v2705_v63 }
 0x48e   :  { %1388 = vadd.xlane.f32.xlu1 %v1357_v60  ;;  %v1078_v60 = vshll.u32 %v1077_v57, 16 }
 0x49d   :  { %v1061_v42 = vpop.xlane.xlu1 %1060 }
 0x49e   :  { %v1062_v32 = vcvt.f32.s32 %v1061_v42  ;;  %v1105_v42 = vcvt.f32.s32 %v2762_v18  ;;  %v1147_v18 = vcvt.f32.s32 %v2781_v9 }
 0x4a0   :  { %v2923_v23 = vadd.s32 %v1064_v11, %v1062_v32  ;;  %v1119_v11 = vcvt.f32.s32 %v2766_v51  ;;  %v1106_v32 = vshll.u32 %v1105_v42, 16  ;;  %v1189_v42 = vcvt.f32.s32 %v2795_v12 }
 0x4a1   :  { %v1089_v1 = vpop.xlane.xlu1 %1088  ;;  %v1047_v35 = vpop.xlane.xlu0 %1046 }
 0x4a2   :  { %v1090_v21 = vcvt.f32.s32 %v1089_v1  ;;  %v1048_v31 = vcvt.f32.s32 %v1047_v35  ;;  %vm1263_vm5 = vcmp.eq.s32.totalorder %v2232_v36, %v2923_v23  ;;  %v1120_v35 = vshll.u32 %v1119_v11, 16 }
 0x4a3   :  { %v1279_v2 = vsel %vm1263_vm5, %v2504_v34, 0.0  ;;  %v1190_v12 = vshll.u32 %v1189_v42, 16  ;;  %vm1425_vm5 = vcmp.eq.s32.totalorder %v2232_v36, 3 }
 0x4a4   :  { %v2929_v16 = vadd.s32 %v1092_v26, %v1090_v21  ;;  %v2931_v3 = vadd.s32 %v1050_v13, %v1048_v31  ;;  %1296 = vadd.xlane.f32.xlu1 %v1279_v2  ;;  %v1161_v2 = vcvt.f32.s32 %v2784_v53  ;;  %v1426_v52 = vsel %vm1425_vm5, %v2859_v33, 0.0 }
 0x4a5   :  { %v1075_v20 = vpop.xlane.xlu0 %1074  ;;  %v1428_v33 = vsel %vm1425_vm5, %v2868_v45, 0.0  ;;  %v1429_v29 = vsel %vm1425_vm5, %v2872_v27, 0.0 }
 0x4a6   :  { %v1076_v19 = vcvt.f32.s32 %v1075_v20  ;;  %vm1265_vm6 = vcmp.eq.s32.totalorder %v2232_v36, %v2929_v16  ;;  %vm1262_vm7 = vcmp.eq.s32.totalorder %v2232_v36, %v2931_v3  ;;  %v1162_v9 = vshll.u32 %v1161_v2, 16 }
 0x4a7   :  { %v1281_v44 = vsel %vm1265_vm6, %v3411_v15, 0.0  ;;  %v1278_v34 = vsel %vm1262_vm7, %v3406_v10, 0.0  ;;  %v1133_v10 = vcvt.f32.s32 %v2776_v24  ;;  %vm1424_vm6 = vcmp.eq.s32.totalorder %v2232_v36, 2 }
 0x4a8   :  { %v2938_v58 = vadd.s32 %v1078_v60, %v1076_v19  ;;  %1300 = vadd.xlane.f32.xlu1 %v1281_v44  ;;  %1294 = vadd.xlane.f32.xlu0 %v1278_v34  ;;  %v1148_v44 = vshll.u32 %v1147_v18, 16 }
 0x4a9   :  { %v1134_v31 = vshll.u32 %v1133_v10, 16 }
 0x4aa   :  { %vm1264_vm8 = vcmp.eq.s32.totalorder %v2232_v36, %v2938_v58 }
 0x4ab   :  { %v1280_v0 = vsel %vm1264_vm8, %v3408_v17, 0.0  ;;  %vm1423_vm8 = vcmp.eq.s32.totalorder %v2232_v36, 1 }
 0x4ac   :  { %1298 = vadd.xlane.f32.xlu0 %v1280_v0 }
 0x4cb   :  { %v1103_v15 = vpop.xlane.xlu0 %1102 }
 0x4cc   :  { %v1104_v26 = vcvt.f32.s32 %v1103_v15  ;;  %v1203_v15 = vcvt.f32.s32 %v2803_v37 }
 0x4ce   :  { %v2946_v13 = vadd.s32 %v1106_v32, %v1104_v26  ;;  %v1117_v1 = vpop.xlane.xlu1 %1116 }
 0x4cf   :  { %v1118_v57 = vcvt.f32.s32 %v1117_v1  ;;  %v1217_v1 = vcvt.f32.s32 %v2807_v54  ;;  %v1204_v54 = vshll.u32 %v1203_v15, 16 }
 0x4d0   :  { %vm1266_vm9 = vcmp.eq.s32.totalorder %v2232_v36, %v2946_v13 }
 0x4d1   :  { %v2951_v21 = vadd.s32 %v1120_v35, %v1118_v57  ;;  %v1282_v17 = vsel %vm1266_vm9, %v3419_v62, 0.0  ;;  %v1175_v62 = vcvt.f32.s32 %v2791_v38  ;;  %vm1406_vm9 = vcmp.eq.s32.totalorder %v2232_v36, 0 }
 0x4d2   :  { %1302 = vadd.xlane.f32.xlu0 %v1282_v17 }
 0x4d3   :  { %v1131_v51 = vpop.xlane.xlu0 %1130  ;;  %vm1267_vm10 = vcmp.eq.s32.totalorder %v2232_v36, %v2951_v21  ;;  %v1176_v38 = vshll.u32 %v1175_v62, 16  ;;  %v1259_v62 = vcvt.f32.s32 %v2824_v39 }
 0x4d4   :  { %v1132_v20 = vcvt.f32.s32 %v1131_v51  ;;  %v1283_v24 = vsel %vm1267_vm10, %v3414_v43, 0.0 }
 0x4d5   :  { %1304 = vadd.xlane.f32.xlu1 %v1283_v24 }
 0x4d6   :  { %v2959_v60 = vadd.s32 %v1134_v31, %v1132_v20  ;;  %v1145_v19 = vpop.xlane.xlu1 %1144  ;;  %v1218_v31 = vshll.u32 %v1217_v1, 16 }
 0x4d7   :  { %v1146_v34 = vcvt.f32.s32 %v1145_v19  ;;  %v1159_v0 = vpop.xlane.xlu0 %1158 }
 0x4d8   :  { %v1160_v11 = vcvt.f32.s32 %v1159_v0  ;;  %vm1268_vm11 = vcmp.eq.s32.totalorder %v2232_v36, %v2959_v60 }
 0x4d9   :  { %v2965_v53 = vadd.s32 %v1148_v44, %v1146_v34  ;;  %v1284_v43 = vsel %vm1268_vm11, %v3423_v6, 0.0 }
 0x4da   :  { %v2969_v32 = vadd.s32 %v1162_v9, %v1160_v11  ;;  %v1173_v26 = vpop.xlane.xlu1 %1172  ;;  %1306 = vadd.xlane.f32.xlu0 %v1284_v43  ;;  %v1900_v11 = vpop.eup %1899  ;;  %v1260_v43 = vshll.u32 %v1259_v62, 16 }
 0x4db   :  { %v1174_v35 = vcvt.f32.s32 %v1173_v26  ;;  %v1187_v57 = vpop.xlane.xlu0 %1186  ;;  %vm1269_vm12 = vcmp.eq.s32.totalorder %v2232_v36, %v2965_v53 }
 0x4dc   :  { %v1188_v10 = vcvt.f32.s32 %v1187_v57  ;;  %v1285_v17 = vsel %vm1269_vm12, %v3426_v50, 0.0  ;;  %vm1270_vm13 = vcmp.eq.s32.totalorder %v2232_v36, %v2969_v32  ;;  %v1231_v50 = vcvt.f32.s32 %v2815_v14 }
 0x4dd   :  { %v2978_v37 = vadd.s32 %v1176_v38, %v1174_v35  ;;  %1308 = vadd.xlane.f32.xlu1 %v1285_v17  ;;  %v1286_v6 = vsel %vm1270_vm13, %v2624_v7, 0.0  ;;  %v3023_v57 = vmul.f32 0.6931472, %v1900_v11  ;;  %v3435_v11 = vld [vmem:[#allocation25_spill] sm:$0xff] }
 0x4de   :  { %v2982_v18 = vadd.s32 %v1190_v12, %v1188_v10  ;;  %v1201_v51 = vpop.xlane.xlu1 %1200  ;;  %1310 = vadd.xlane.f32.xlu0 %v1286_v6  ;;  %v1232_v55 = vshll.u32 %v1231_v50, 16  ;;  %1917 = vlog2.f32 %v3435_v11  ;;  %v3440_v11 = vld [vmem:[#allocation28_spill] sm:$0xff] }
 0x4df   :  { %v1202_v2 = vcvt.f32.s32 %v1201_v51  ;;  %v1215_v20 = vpop.xlane.xlu0 %1214  ;;  %vm1271_vm14 = vcmp.eq.s32.totalorder %v2232_v36, %v2978_v37 }
 0x4e0   :  { %v1216_v24 = vcvt.f32.s32 %v1215_v20  ;;  %v1287_v7 = vsel %vm1271_vm14, %v3430_v61, 0.0  ;;  %vm1272_vm15 = vcmp.eq.s32.totalorder %v2232_v36, %v2982_v18 }
 0x4e1   :  { %v2992_v5 = vadd.s32 %v1204_v54, %v1202_v2  ;;  %1312 = vadd.xlane.f32.xlu1 %v1287_v7  ;;  %v1288_v14 = vsel %vm1272_vm15, %v3429_v22, 0.0 }
 0x4e2   :  { %v2996_v19 = vadd.s32 %v1218_v31, %v1216_v24  ;;  %v1229_v44 = vpop.xlane.xlu1 %1228  ;;  %1314 = vadd.xlane.f32.xlu0 %v1288_v14 }
 0x4e3   :  { %v1230_v61 = vcvt.f32.s32 %v1229_v44  ;;  %v1243_v34 = vpop.xlane.xlu0 %1242  ;;  %vm1273_vm1 = vcmp.eq.s32.totalorder %v2232_v36, %v2992_v5 }
 0x4e4   :  { %v1244_v0 = vcvt.f32.s32 %v1243_v34  ;;  %v1289_v9 = vsel %vm1273_vm1, %v3433_v25, 0.0  ;;  %vm1274_vm3 = vcmp.eq.s32.totalorder %v2232_v36, %v2996_v19  ;;  %v1902_v25 = vpop.eup %1901 }
 0x4e5   :  { %v3004_v56 = vadd.s32 %v1232_v55, %v1230_v61  ;;  %1316 = vadd.xlane.f32.xlu1 %v1289_v9  ;;  %v1290_v22 = vsel %vm1274_vm3, %v2682_v28, 0.0  ;;  %v1904_v12 = vpop.eup %1903  ;;  %v3033_v6 = vmul.f32 0.6931472, %v1902_v25 }
 0x4e6   :  { %v3007_v42 = vadd.s32 %v1246_v48, %v1244_v0  ;;  %v1257_v39 = vpop.xlane.xlu1 %1256  ;;  %1318 = vadd.xlane.f32.xlu0 %v1290_v22  ;;  %v1906_v10 = vpop.eup %1905  ;;  %v3039_v31 = vmul.f32 0.6931472, %v1904_v12  ;;  %v3434_v0 = vld [vmem:[#allocation16_spill] sm:$0xff] }
 0x4e7   :  { %v1258_v15 = vcvt.f32.s32 %v1257_v39  ;;  %v3009_v26 = vpop.xlane.xlu0 %734  ;;  %vm1275_vm4 = vcmp.eq.s32.totalorder %v2232_v36, %v3004_v56  ;;  %v3054_v24 = vmul.f32 0.6931472, %v1906_v10  ;;  %v1908_v55 = vpop.eup %1907  ;;  %v1431_v27 = vsel %vm1425_vm5, %v3434_v0, 0.0 }
 0x4e8   :  { %v1291_v38 = vsel %vm1275_vm4, %v2691_v30, 0.0  ;;  %vm1276_vm2 = vcmp.eq.s32.totalorder %v2232_v36, %v3007_v42  ;;  %v3069_v62 = vmul.f32 0.6931472, %v1908_v55  ;;  %v1910_v49 = vpop.eup %1909 }
 0x4e9   :  { %v3016_v1 = vadd.s32 %v1260_v43, %v1258_v15  ;;  %1320 = vadd.xlane.f32.xlu1 %v1291_v38  ;;  %v1292_v28 = vsel %vm1276_vm2, %v2695_v8, 0.0  ;;  %v3436_v43 = vld [vmem:[#allocation24_spill] sm:$0xff]  ;;  %v3087_v47 = vmul.f32 0.6931472, %v1910_v49  ;;  %v1912_v15 = vpop.eup %1911 }
 0x4ea   :  { %v3021_v35 = vpop.xlane.xlu1 %736  ;;  %1322 = vadd.xlane.f32.xlu0 %v1292_v28  ;;  %1919 = vlog2.f32 %v3436_v43  ;;  %v3437_v28 = vld [vmem:[#allocation26_spill] sm:$0xff]  ;;  %v1433_v43 = vsel %vm1425_vm5, %v3440_v11, 0.0 }
 0x4eb   :  { %v1359_v30 = vpop.xlane.xlu0 %1358  ;;  %vm1277_vm7 = vcmp.eq.s32.totalorder %v2232_v36, %v3016_v1  ;;  %v1430_v12 = vsel %vm1425_vm5, %v3437_v28, 0.0 }
 0x4ec   :  { %v1390_v17 = vsub.f32 %v3023_v57, %v1359_v30  ;;  %v1293_v8 = vsel %vm1277_vm7, %v2705_v63, 0.0  ;;  %v1427_v63 = vsel %vm1425_vm5, %v2864_v59, 0.0  ;;  %v3438_v30 = vld [vmem:[#allocation17_spill] sm:$0xff] }
 0x4ed   :  { %1324 = vadd.xlane.f32.xlu1 %v1293_v8  ;;  %1921 = vlog2.f32 %v3438_v30  ;;  %v1914_v8 = vpop.eup %1913 }
 0x4ee   :  { %v3037_v54 = vsel %vm1424_vm6, %v1390_v17, %v1426_v52  ;;  %v1361_v51 = vpop.xlane.xlu1 %1360  ;;  %v3098_v17 = vmul.f32 0.6931472, %v1912_v15  ;;  %1923 = vlog2.f32 %v2892_v46  ;;  %v3441_v15 = vld [vmem:[#allocation19_spill] sm:$0xff] }
 0x4ef   :  { %v1391_v50 = vsub.f32 %v3033_v6, %v1361_v51  ;;  %v1363_v2 = vpop.xlane.xlu0 %1362  ;;  %v1916_v51 = vpop.eup %1915  ;;  %1925 = vlog2.f32 %v3441_v15 }
 0x4f0   :  { %v1392_v20 = vsub.f32 %v3039_v31, %v1363_v2  ;;  %v3111_v55 = vmul.f32 0.6931472, %v1916_v51  ;;  %1927 = vlog2.f32 %v2901_v40 }
 0x4f1   :  { %v3052_v41 = vsel %vm1424_vm6, %v1391_v50, %v1427_v63  ;;  %v3439_v63 = vld [vmem:[#allocation27_spill] sm:$0xff] }
 0x4f2   :  { %v3058_v7 = vsel %vm1424_vm6, %v1392_v20, %v1428_v33  ;;  %v1365_v14 = vpop.xlane.xlu1 %1364  ;;  %v1432_v20 = vsel %vm1425_vm5, %v3439_v63, 0.0  ;;  %v1435_v63 = vsel %vm1425_vm5, %v3021_v35, 0.0 }
 0x4f3   :  { %v1393_v59 = vsub.f32 %v3054_v24, %v1365_v14  ;;  %v739_v44 = vpop.xlane.xlu0 %738  ;;  %v3108_v14 = vmul.f32 0.6931472, %v1914_v8 }
 0x4f5   :  { %v3067_v45 = vsel %vm1424_vm6, %v1393_v59, %v1429_v29  ;;  %v1918_v59 = vpop.eup %1917 }
 0x4f7   :  { %v3071_v61 = vpop.xlane.xlu0 %742  ;;  %v1369_v34 = vpop.xlane.xlu1 %1368 }
 0x4f8   :  { %v1395_v48 = vsub.f32 %v3069_v62, %v1369_v34  ;;  %v1920_v34 = vpop.eup %1919  ;;  %v1438_v15 = vsel %vm1425_vm5, %v3071_v61, 0.0 }
 0x4f9   :  { %v3132_v28 = vmul.f32 0.6931472, %v1920_v34 }
 0x4fa   :  { %v3081_v9 = vsel %vm1424_vm6, %v1395_v48, %v1431_v27  ;;  %v1434_v27 = vsel %vm1425_vm5, %v3009_v26, 0.0 }
 0x4fb   :  { %v3083_v22 = vpop.xlane.xlu0 %746  ;;  %v741_v39 = vpop.xlane.xlu1 %740 }
 0x4ff   :  { %v1367_v4 = vpop.xlane.xlu0 %1366  ;;  %v745_v25 = vpop.xlane.xlu1 %744 }
 0x500   :  { %v1394_v38 = vsub.f32 %v3087_v47, %v1367_v4  ;;  %v3126_v4 = vmul.f32 0.6931472, %v1918_v59 }
 0x502   :  { %v3096_v10 = vsel %vm1424_vm6, %v1394_v38, %v1430_v12  ;;  %v1922_v12 = vpop.eup %1921 }
 0x503   :  { %v1371_v52 = vpop.xlane.xlu0 %1370  ;;  %v749_v50 = vpop.xlane.xlu1 %748  ;;  %v3151_v59 = vmul.f32 0.6931472, %v1922_v12 }
 0x504   :  { %v1396_v2 = vsub.f32 %v3098_v17, %v1371_v52  ;;  %v1436_v52 = vsel %vm1425_vm5, %v739_v44, 0.0  ;;  %v1924_v44 = vpop.eup %1923 }
 0x506   :  { %v3106_v33 = vsel %vm1424_vm6, %v1396_v2, %v1432_v20  ;;  %v3442_v2 = vld [vmem:[#allocation30_spill] sm:$0xff] }
 0x507   :  { %v1375_v29 = vpop.xlane.xlu0 %1374  ;;  %v1373_v48 = vpop.xlane.xlu1 %1372  ;;  %1929 = vlog2.f32 %v3442_v2 }
 0x508   :  { %v1398_v0 = vsub.f32 %v3108_v14, %v1375_v29  ;;  %v1397_v49 = vsub.f32 %v3111_v55, %v1373_v48  ;;  %v1437_v48 = vsel %vm1425_vm5, %v741_v39, 0.0 }
 0x50a   :  { %v3124_v46 = vsel %vm1424_vm6, %v1398_v0, %v1434_v27  ;;  %v3130_v38 = vsel %vm1424_vm6, %v1397_v49, %v1433_v43  ;;  %v1926_v0 = vpop.eup %1925  ;;  %v3160_v27 = vmul.f32 0.6931472, %v1924_v44  ;;  %v1440_v44 = vsel %vm1425_vm5, %v3083_v22, 0.0 }
 0x50b   :  { %v1379_v26 = vpop.xlane.xlu0 %1378  ;;  %v1377_v30 = vpop.xlane.xlu1 %1376 }
 0x50c   :  { %v1400_v8 = vsub.f32 %v3126_v4, %v1379_v26  ;;  %v1399_v51 = vsub.f32 %v3132_v28, %v1377_v30  ;;  %v1928_v11 = vpop.eup %1927  ;;  %v3166_v26 = vmul.f32 0.6931472, %v1926_v0  ;;  %v1441_v0 = vsel %vm1425_vm5, %v749_v50, 0.0 }
 0x50e   :  { %v3145_v20 = vsel %vm1424_vm6, %v1400_v8, %v1436_v52  ;;  %v3149_v40 = vsel %vm1424_vm6, %v1399_v51, %v1435_v63  ;;  %v3173_v52 = vmul.f32 0.6931472, %v1928_v11  ;;  %v1439_v51 = vsel %vm1425_vm5, %v745_v25, 0.0 }
 0x50f   :  { %v1381_v29 = vpop.xlane.xlu1 %1380 }
 0x510   :  { %v1401_v34 = vsub.f32 %v3151_v59, %v1381_v29 }
 0x511   :  { %v1930_v12 = vpop.eup %1929 }
 0x512   :  { %v3158_v35 = vsel %vm1424_vm6, %v1401_v34, %v1437_v48  ;;  %v3182_v29 = vmul.f32 0.6931472, %v1930_v12 }
 0x514   :  { %v1383_v49 = vpop.xlane.xlu0 %1382 }
 0x515   :  { %v1402_v43 = vsub.f32 %v3160_v27, %v1383_v49 }
 0x517   :  { %v3170_v39 = vsel %vm1424_vm6, %v1402_v43, %v1438_v15  ;;  %v1385_v30 = vpop.xlane.xlu1 %1384  ;;  %v1408_v43 = vcvt.s32.f32 %v2923_v23 }
 0x518   :  { %v1403_v8 = vsub.f32 %v3166_v26, %v1385_v30  ;;  %v1387_v2 = vpop.xlane.xlu0 %1386 }
 0x519   :  { %v1404_v61 = vsub.f32 %v3173_v52, %v1387_v2 }
 0x51a   :  { %v3179_v63 = vsel %vm1424_vm6, %v1403_v8, %v1439_v51  ;;  %v1410_v51 = vcvt.s32.f32 %v2929_v16 }
 0x51b   :  { %v1389_v34 = vpop.xlane.xlu1 %1388  ;;  %v3189_v48 = vsel %vm1424_vm6, %v1404_v61, %v1440_v44 }
 0x51c   :  { %v1405_v25 = vsub.f32 %v3182_v29, %v1389_v34 }
 0x51e   :  { %v3196_v49 = vsel %vm1424_vm6, %v1405_v25, %v1441_v0  ;;  %v1411_v25 = vcvt.s32.f32 %v2946_v13 }
 0x531   :  { %v1297_v11 = vpop.xlane.xlu1 %1296 }
 0x532   :  { %v1327_v22 = vsub.f32 %v1297_v11, %v3033_v6  ;;  %v1407_v6 = vcvt.s32.f32 %v2931_v3  ;;  %v1412_v11 = vcvt.s32.f32 %v2951_v21 }
 0x534   :  { %v1459_v15 = vsel %vm1423_vm8, %v1327_v22, %v3052_v41 }
 0x535   :  { %v1475_v50 = vsel %vm1406_vm9, %v1408_v43, %v1459_v15  ;;  %v1301_v12 = vpop.xlane.xlu1 %1300  ;;  %v1295_v8 = vpop.xlane.xlu0 %1294  ;;  %v1413_v43 = vcvt.s32.f32 %v2959_v60 }
 0x536   :  { %1491 = vst.msk [vmem:[#allocation11 + $0x8] sm:$0xff] %vm120_vm0, %v1475_v50  ;;  %v1329_v30 = vsub.f32 %v1301_v12, %v3054_v24  ;;  %v1326_v2 = vsub.f32 %v1295_v8, %v3023_v57  ;;  %v1409_v57 = vcvt.s32.f32 %v2938_v58  ;;  %v1414_v12 = vcvt.s32.f32 %v2965_v53 }
 0x538   :  { %v1461_v23 = vsel %vm1423_vm8, %v1329_v30, %v3067_v45  ;;  %v1458_v61 = vsel %vm1423_vm8, %v1326_v2, %v3037_v54  ;;  %v1417_v2 = vcvt.s32.f32 %v2982_v18 }
 0x539   :  { %v1477_v41 = vsel %vm1406_vm9, %v1410_v51, %v1461_v23  ;;  %v1474_v16 = vsel %vm1406_vm9, %v1407_v6, %v1458_v61  ;;  %v1299_v24 = vpop.xlane.xlu0 %1298  ;;  %v1416_v51 = vcvt.s32.f32 %v2978_v37  ;;  %v1419_v61 = vcvt.s32.f32 %v2996_v19 }
 0x53a   :  { %1493 = vst.msk [vmem:[#allocation11 + $0x18] sm:$0xff] %vm120_vm0, %v1477_v41  ;;  %1490 = vst.msk [vmem:[#allocation11] sm:$0xff] %vm120_vm0, %v1474_v16  ;;  %v1328_v3 = vsub.f32 %v1299_v24, %v3039_v31  ;;  %v1418_v41 = vcvt.s32.f32 %v2992_v5 }
 0x53c   :  { %v1460_v45 = vsel %vm1423_vm8, %v1328_v3, %v3058_v7  ;;  %v1420_v3 = vcvt.s32.f32 %v3004_v56 }
 0x53d   :  { %v1476_v44 = vsel %vm1406_vm9, %v1409_v57, %v1460_v45  ;;  %v1421_v57 = vcvt.s32.f32 %v3007_v42  ;;  %v1422_v42 = vcvt.s32.f32 %v3016_v1 }
 0x53e   :  { %1492 = vst.msk [vmem:[#allocation11 + $0x10] sm:$0xff] %vm120_vm0, %v1476_v44 }
 0x55f   :  { %v1303_v54 = vpop.xlane.xlu0 %1302 }
 0x560   :  { %v1330_v34 = vsub.f32 %v1303_v54, %v3087_v47 }
 0x562   :  { %v1462_v31 = vsel %vm1423_vm8, %v1330_v34, %v3096_v10  ;;  %v1305_v0 = vpop.xlane.xlu1 %1304 }
 0x563   :  { %v1478_v58 = vsel %vm1406_vm9, %v1411_v25, %v1462_v31  ;;  %v1331_v7 = vsub.f32 %v1305_v0, %v3069_v62 }
 0x564   :  { %1494 = vst.msk [vmem:[#allocation11 + $0x20] sm:$0xff] %vm120_vm0, %v1478_v58 }
 0x565   :  { %v1463_v47 = vsel %vm1423_vm8, %v1331_v7, %v3081_v9 }
 0x566   :  { %v1479_v13 = vsel %vm1406_vm9, %v1412_v11, %v1463_v47 }
 0x567   :  { %1495 = vst.msk [vmem:[#allocation11 + $0x28] sm:$0xff] %vm120_vm0, %v1479_v13  ;;  %v1307_v10 = vpop.xlane.xlu0 %1306 }
 0x568   :  { %v1332_v22 = vsub.f32 %v1307_v10, %v3098_v17  ;;  %v1415_v17 = vcvt.s32.f32 %v2969_v32 }
 0x56a   :  { %v1464_v21 = vsel %vm1423_vm8, %v1332_v22, %v3106_v33  ;;  %v1309_v62 = vpop.xlane.xlu1 %1308 }
 0x56b   :  { %v1480_v15 = vsel %vm1406_vm9, %v1413_v43, %v1464_v21  ;;  %v1333_v9 = vsub.f32 %v1309_v62, %v3111_v55  ;;  %v1311_v50 = vpop.xlane.xlu0 %1310 }
 0x56c   :  { %1496 = vst.msk [vmem:[#allocation11 + $0x30] sm:$0xff] %vm120_vm0, %v1480_v15  ;;  %v1334_v30 = vsub.f32 %v1311_v50, %v3108_v14 }
 0x56d   :  { %v1465_v60 = vsel %vm1423_vm8, %v1333_v9, %v3130_v38 }
 0x56e   :  { %v1481_v33 = vsel %vm1406_vm9, %v1414_v12, %v1465_v60  ;;  %v1466_v55 = vsel %vm1423_vm8, %v1334_v30, %v3124_v46  ;;  %v1313_v8 = vpop.xlane.xlu1 %1312 }
 0x56f   :  { %1497 = vst.msk [vmem:[#allocation11 + $0x38] sm:$0xff] %vm120_vm0, %v1481_v33  ;;  %v1482_v53 = vsel %vm1406_vm9, %v1415_v17, %v1466_v55  ;;  %v1335_v14 = vsub.f32 %v1313_v8, %v3132_v28  ;;  %v1315_v32 = vpop.xlane.xlu0 %1314 }
 0x570   :  { %1498 = vst.msk [vmem:[#allocation11 + $0x40] sm:$0xff] %vm120_vm0, %v1482_v53  ;;  %v1336_v38 = vsub.f32 %v1315_v32, %v3126_v4 }
 0x571   :  { %v1467_v46 = vsel %vm1423_vm8, %v1335_v14, %v3149_v40 }
 0x572   :  { %v1483_v6 = vsel %vm1406_vm9, %v1416_v51, %v1467_v46  ;;  %v1468_v28 = vsel %vm1423_vm8, %v1336_v38, %v3145_v20  ;;  %v1317_v23 = vpop.xlane.xlu1 %1316 }
 0x573   :  { %1499 = vst.msk [vmem:[#allocation11 + $0x48] sm:$0xff] %vm120_vm0, %v1483_v6  ;;  %v1484_v37 = vsel %vm1406_vm9, %v1417_v2, %v1468_v28  ;;  %v1337_v4 = vsub.f32 %v1317_v23, %v3151_v59  ;;  %v1319_v18 = vpop.xlane.xlu0 %1318 }
 0x574   :  { %1500 = vst.msk [vmem:[#allocation11 + $0x50] sm:$0xff] %vm120_vm0, %v1484_v37  ;;  %v1338_v40 = vsub.f32 %v1319_v18, %v3160_v27 }
 0x575   :  { %v1469_v20 = vsel %vm1423_vm8, %v1337_v4, %v3158_v35 }
 0x576   :  { %v1485_v16 = vsel %vm1406_vm9, %v1418_v41, %v1469_v20  ;;  %v1470_v59 = vsel %vm1423_vm8, %v1338_v40, %v3170_v39  ;;  %v1321_v24 = vpop.xlane.xlu1 %1320 }
 0x577   :  { %1501 = vst.msk [vmem:[#allocation11 + $0x58] sm:$0xff] %vm120_vm0, %v1485_v16  ;;  %v1486_v5 = vsel %vm1406_vm9, %v1419_v61, %v1470_v59  ;;  %v1339_v27 = vsub.f32 %v1321_v24, %v3166_v26  ;;  %v1323_v19 = vpop.xlane.xlu0 %1322 }
 0x578   :  { %1502 = vst.msk [vmem:[#allocation11 + $0x60] sm:$0xff] %vm120_vm0, %v1486_v5  ;;  %v1340_v35 = vsub.f32 %v1323_v19, %v3173_v52 }
 0x579   :  { %v1471_v39 = vsel %vm1423_vm8, %v1339_v27, %v3179_v63 }
 0x57a   :  { %v1487_v45 = vsel %vm1406_vm9, %v1420_v3, %v1471_v39  ;;  %v1472_v26 = vsel %vm1423_vm8, %v1340_v35, %v3189_v48  ;;  %v1325_v44 = vpop.xlane.xlu1 %1324 }
 0x57b   :  { %1503 = vst.msk [vmem:[#allocation11 + $0x68] sm:$0xff] %vm120_vm0, %v1487_v45  ;;  %v1488_v56 = vsel %vm1406_vm9, %v1421_v57, %v1472_v26  ;;  %v1341_v52 = vsub.f32 %v1325_v44, %v3182_v29 }
 0x57c   :  { %1504 = vst.msk [vmem:[#allocation11 + $0x70] sm:$0xff] %vm120_vm0, %v1488_v56 }
 0x57d   :  { %v1473_v63 = vsel %vm1423_vm8, %v1341_v52, %v3196_v49 }
 0x57e   :  { %v1489_v54 = vsel %vm1406_vm9, %v1422_v42, %v1473_v63 }
 0x57f   :  { %1505 = vst.msk [vmem:[#allocation11 + $0x78] sm:$0xff] %vm120_vm0, %v1489_v54 }
 0x580   :  { %1510 = vsyncadd [#allocation4], 1920  ;;  %s2078_s7 = smov [#allocation11]  }
 0x581   :  { %s1511_s27 = sshll.u32 %s2078_s7, 4  ;;  %s1512_s27 = int_to_ptr.vmem [resolvable:$true] %s1511_s27 }
 0x582   :  { %s2041_s29 = scalar_lea.vmem %s1512_s27, 128  ;;  %s2045_s30 = scalar_lea.vmem %s1512_s27, 2048 }
 0x583   :  { %p2042_p12 = scmp.ne.s32.totalorder %s1512_s27, %s2041_s29  ;;  %p2046_p13 = scmp.lt.s32.totalorder %s1512_s27, %s1512_s27 }
 0x584   :  { %p2047_p0 = scmp.lt.s32.totalorder %s2045_s30, %s2041_s29 }
 0x586   :  { %p2048_p1 = por %p2047_p0, %p2046_p13 }
 0x588   :  { %p2049_p2 = pnand %p2048_p1, %p2042_p12 }
 0x58a   :  { %2052 = shalt.err (!%p2049_p2)
}
 0x58b   :  { %s2053_s28 = scalar_lea.hbm %s3351_s8, 128 }
 0x58c   :  { %p2054_p3 = scmp.ne.s32.totalorder %s3351_s8, %s2053_s28  ;;  %p2057_p4 = scmp.lt.u32.totalorder %s2053_s28, %s3351_s8 }
 0x58e   :  { %p2059_p5 = pnand %p2057_p4, %p2054_p3 }
 0x590   :  { %2062 = shalt.err (!%p2059_p5)
}
 0x591   :  { %1517 = dma.vmem_to_hbm [thread:$0]  %s1512_s27, 128, %s3351_s8, [#allocation4], %s2072_s16, %s2072_s16, %s2073_s17  }
 0x592   :  { %2069 = dma.done.wait [#allocation4], 2048  }
 0x593   :  { %2070 = vsyncadd [#allocation4], 4294965248 }
 0x594   :  { %1521 = vsyncpa [#allocation3], 1 }
 0x595   :  { %1522 = vsyncpa [#allocation6], 1 }
 0x596   :  { %1523 = vsyncpa [#allocation9], 1 }
 0x597   :  { %1524 = vsyncpa [#allocation4], 1 }

</bundles_post_ra>
